<compile_context>
chip_gen: v7x
topology: tpu7x:2x2x1
jax: 0.10.0
libtpu: 0.0.40
codegen_flags: <defaults>
</compile_context>

<pallas_src>
import functools

import jax
import jax.numpy as jnp
from jax.experimental import pallas as pl
from jax.experimental.pallas import tpu as pltpu


# ----------------------------- helpers -----------------------------

def _round_up(x, m):
    return (x + m - 1) // m * m


def _choose_block_h(H, block_h):
    """Row-band height: must divide H and be even (unless it is the whole image)."""
    if (block_h is not None and H % block_h == 0 and block_h >= 2
            and (block_h % 2 == 0 or block_h == H)):
        return block_h
    for th in (16, 8, 4, 2):
        if H % th == 0:
            return th
    return H


# ----------------------------- fused conv / residual-block kernel -----------------------------

def _fused_conv_kernel(*refs, two_convs, has_skip, relu_in, TH, W, Wp, mxu_dtype):
    """One row-band of either:
         y = conv3x3(x) + b1                                  (two_convs=False)
         y = x [+ skip] + conv3x3(relu(conv3x3(relu(x))+b1)) + b2   (two_convs=True)
    """
    it = iter(refs)
    xt_ref = next(it)            # (1, 2,  W, Ci)  rows r0-2 .. r0-1   (valid when band > 0)
    xm_ref = next(it)            # (1, TH, W, Ci)  rows r0   .. r0+TH-1
    xb_ref = next(it)            # (1, 2,  W, Ci)  rows r0+TH .. r0+TH+1 (valid when band < last)
    w1_ref = next(it)            # (3, 3, Ci, Co)  mxu dtype
    b1_ref = next(it)            # (1, Co)         f32
    if two_convs:
        w2_ref = next(it)
        b2_ref = next(it)
    if has_skip:
        skip_ref = next(it)      # (1, TH, W, Co)
    o_ref = next(it)             # (1, TH, W, Co)
    x_buf = next(it)             # (TH+6, Wp, Ci)  scratch, mxu dtype
    if two_convs:
        t_buf = next(it)         # (TH+4, Wp, Co)  scratch, mxu dtype
    assert next(it, None) is None

    b = pl.program_id(1)
    nb = pl.num_programs(1)
    Ci = xm_ref.shape[-1]
    Co = o_ref.shape[-1]

    # ---------- build the zero-padded input band in VMEM (replaces wrapper jnp.pad) ----------
    # x_buf rows: 0 = guard (only its zero pad columns are ever read),
    #             1 .. TH+4 = image rows r0-2 .. r0+TH+1 (zero where outside the image),
    #             TH+5 = guard.
    # x_buf cols: 0 .. W-1 = data, W .. Wp-1 = zero padding (also acts as the left pad of
    # the next row when the buffer is flattened).
    x_buf[:, W:Wp, :] = jnp.zeros((TH + 6, Wp - W, Ci), x_buf.dtype)

    @pl.when(b == 0)
    def _():
        x_buf[1:3, 0:W, :] = jnp.zeros((2, W, Ci), x_buf.dtype)

    @pl.when(b > 0)
    def _():
        x_buf[1:3, 0:W, :] = xt_ref[0].astype(x_buf.dtype)

    x_buf[3:TH + 3, 0:W, :] = xm_ref[0].astype(x_buf.dtype)

    @pl.when(b == nb - 1)
    def _():
        x_buf[TH + 3:TH + 5, 0:W, :] = jnp.zeros((2, W, Ci), x_buf.dtype)

    @pl.when(b < nb - 1)
    def _():
        x_buf[TH + 3:TH + 5, 0:W, :] = xb_ref[0].astype(x_buf.dtype)

    # ---------- 3x3 conv = 9 MXU matmuls over shifted flat views of the padded buffer ----------
    def conv_taps(flat, w_ref, n_rows, row_off, cout):
        """acc[r*Wp + c] = sum_{dy,dx} flat[(r + row_off + dy)*Wp + c + dx - 1] @ w[dy, dx]."""
        acc = jnp.zeros((n_rows * Wp, cout), jnp.float32)
        for dx in range(3):
            lo = row_off * Wp + dx - 1                     # >= Wp - 1 >= 0
            shifted = flat[lo:lo + (n_rows + 2) * Wp]      # misaligned only for dx != 1
            for dy in range(3):
                slab = shifted[dy * Wp:(dy + n_rows) * Wp]  # sublane-aligned, reshape-free
                acc = acc + jnp.dot(slab, w_ref[dy, dx],
                                    preferred_element_type=jnp.float32)
        return acc

    xv = x_buf[...]
    if relu_in:
        xv = jnp.maximum(xv, 0.0)                          # relu(0) = 0 keeps the padding valid
    xf = xv.reshape((TH + 6) * Wp, Ci)                     # free: Wp % 8 == 0

    if not two_convs:
        acc = conv_taps(xf, w1_ref, TH, 2, Co)             # output rows r0 .. r0+TH-1
        out = acc.reshape(TH, Wp, Co)[:, 0:W, :] + b1_ref[...]
        if has_skip:
            out = out + skip_ref[0]
    else:
        # conv1 on rows r0-1 .. r0+TH (one extra row each side = conv2's halo), kept in VMEM.
        acc1 = conv_taps(xf, w1_ref, TH + 2, 1, Co)
        u = jnp.maximum(acc1.reshape(TH + 2, Wp, Co) + b1_ref[...], 0.0)

        # t_buf rows: 0 guard / 1..TH+2 = u at rows r0-1..r0+TH / TH+3 guard.
        t_buf[1:TH + 3, :, :] = u.astype(t_buf.dtype)
        t_buf[:, W:Wp, :] = jnp.zeros((TH + 4, Wp - W, Co), t_buf.dtype)

        @pl.when(b == 0)
        def _():
            t_buf[1, :, :] = jnp.zeros((Wp, Co), t_buf.dtype)       # row r0-1 outside image

        @pl.when(b == nb - 1)
        def _():
            t_buf[TH + 2, :, :] = jnp.zeros((Wp, Co), t_buf.dtype)  # row r0+TH outside image

        tf = t_buf[...].reshape((TH + 4) * Wp, Co)                  # free: Wp % 8 == 0
        acc2 = conv_taps(tf, w2_ref, TH, 1, Co)
        out = acc2.reshape(TH, Wp, Co)[:, 0:W, :] + b2_ref[...]
        out = out + xm_ref[0]                                       # residual add (f32)
        if has_skip:
            out = out + skip_ref[0]                                 # fused upsample-skip add (f32)

    o_ref[0] = out.astype(o_ref.dtype)


def _fused_conv_call(x, weights, *, two_convs, relu_in, skip=None,
                     block_h=None, mxu_dtype=jnp.bfloat16, vmem_limit_bytes=None):
    """x: (N, H, W, Ci) NHWC.  weights: (w1,b1) or (w1,b1,w2,b2) with w (3,3,Ci,Co)."""
    N, H, W, Ci = x.shape
    if two_convs:
        w1, b1, w2, b2 = weights
    else:
        w1, b1 = weights
    Co = w1.shape[-1]

    TH = _choose_block_h(H, block_h)
    nb = H // TH
    Wp = _round_up(W + 1, 8)   # padded width: >= W+1 zero columns, multiple of 8
    hh = TH // 2               # halo blocks are 2 rows tall

    w_args = [w1.astype(mxu_dtype), b1.reshape(1, Co).astype(jnp.float32)]
    w_specs = [pl.BlockSpec((3, 3, Ci, Co), lambda n, b: (0, 0, 0, 0)),
               pl.BlockSpec((1, Co), lambda n, b: (0, 0))]
    if two_convs:
        w_args += [w2.astype(mxu_dtype), b2.reshape(1, Co).astype(jnp.float32)]
        w_specs += [pl.BlockSpec((3, 3, Co, Co), lambda n, b: (0, 0, 0, 0)),
                    pl.BlockSpec((1, Co), lambda n, b: (0, 0))]

    in_specs = [
        # 2-row halo above the band (clamped at the top border; zeroed in-kernel there)
        pl.BlockSpec((1, 2, W, Ci), lambda n, b: (n, jnp.maximum(b * hh - 1, 0), 0, 0)),
        # the band itself
        pl.BlockSpec((1, TH, W, Ci), lambda n, b: (n, b, 0, 0)),
        # 2-row halo below the band (clamped at the bottom border; zeroed in-kernel there)
        pl.BlockSpec((1, 2, W, Ci), lambda n, b: (n, jnp.minimum(b * hh + hh, H // 2 - 1), 0, 0)),
    ] + w_specs
    args = [x, x, x] + w_args
    if skip is not None:
        in_specs.append(pl.BlockSpec((1, TH, W, Co), lambda n, b: (n, b, 0, 0)))
        args.append(skip)

    scratch = [pltpu.VMEM((TH + 6, Wp, Ci), mxu_dtype)]
    if two_convs:
        scratch.append(pltpu.VMEM((TH + 4, Wp, Co), mxu_dtype))

    kernel = functools.partial(
        _fused_conv_kernel, two_convs=two_convs, has_skip=skip is not None,
        relu_in=relu_in, TH=TH, W=W, Wp=Wp, mxu_dtype=mxu_dtype)

    cparams = dict(dimension_semantics=("parallel", "parallel"))
    if vmem_limit_bytes is not None:
        cparams["vmem_limit_bytes"] = vmem_limit_bytes

    return pl.pallas_call(
        kernel,
        out_shape=jax.ShapeDtypeStruct((N, H, W, Co), x.dtype),
        grid_spec=pltpu.PrefetchScalarGridSpec(
            num_scalar_prefetch=0,
            grid=(N, nb),
            in_specs=in_specs,
            out_specs=pl.BlockSpec((1, TH, W, Co), lambda n, b: (n, b, 0, 0)),
            scratch_shapes=scratch),
        compiler_params=pltpu.CompilerParams(**cparams),
    )(*args)


# ----------------------- bilinear upsample (plain-JAX glue, exact) -----------------------

def _interp_matrix(out_size, in_size, dtype=jnp.float32):
    # PyTorch bilinear, align_corners=False (the F.upsample default behaviour):
    # src = (dst + 0.5) * in/out - 0.5, clamped below at 0.
    scale = in_size / out_size
    i = jnp.arange(out_size, dtype=jnp.float32)
    src = jnp.maximum((i + 0.5) * scale - 0.5, 0.0)
    lo = jnp.minimum(jnp.floor(src).astype(jnp.int32), in_size - 1)
    hi = jnp.minimum(lo + 1, in_size - 1)
    frac = src - lo.astype(jnp.float32)
    oh_lo = jax.nn.one_hot(lo, in_size, dtype=dtype)
    oh_hi = jax.nn.one_hot(hi, in_size, dtype=dtype)
    return (1.0 - frac)[:, None] * oh_lo + frac[:, None] * oh_hi


def bilinear_upsample_nhwc(x, out_h, out_w):
    _, in_h, in_w, _ = x.shape
    Rh = _interp_matrix(out_h, in_h, x.dtype)
    Rw = _interp_matrix(out_w, in_w, x.dtype)
    t = jnp.einsum('ih,nhwc->niwc', Rh, x)
    return jnp.einsum('jw,niwc->nijc', Rw, t)


# ------------------------------ RefinementModule ------------------------------

def refinement_module(params, x_top_nchw, x_low_nchw, *, block_h=None,
                      mxu_dtype=jnp.bfloat16, vmem_limit_bytes=None):
    # PyTorch NCHW -> NHWC kernel layout
    x_top = jnp.transpose(x_top_nchw, (0, 2, 3, 1))
    x_low = jnp.transpose(x_low_nchw, (0, 2, 3, 1))
    N, H, W, _ = x_low.shape

    # x_top = F.upsample(x_top, (h, w), mode='bilinear')   (align_corners=False)
    x_up = bilinear_upsample_nhwc(x_top, H, W)

    kw = dict(block_h=block_h, mxu_dtype=mxu_dtype, vmem_limit_bytes=vmem_limit_bytes)

    # k1: y0 = self.conv(x_low)
    y0 = _fused_conv_call(x_low, (params['conv_w'], params['conv_b']),
                          two_convs=False, relu_in=False, **kw)
    # k2: x = x_up + RB1(y0)   (RB fused, upsample-skip add folded in as a residual input)
    x = _fused_conv_call(y0, (params['rb1_w1'], params['rb1_b1'],
                              params['rb1_w2'], params['rb1_b2']),
                         two_convs=True, relu_in=True, skip=x_up, **kw)
    # k3: out = RB2(x)
    out = _fused_conv_call(x, (params['rb2_w1'], params['rb2_b1'],
                               params['rb2_w2'], params['rb2_b2']),
                           two_convs=True, relu_in=True, **kw)

    return jnp.transpose(out, (0, 3, 1, 2))   # back to NCHW


def init_params(key, in_dim, out_dim, dtype=jnp.float32):
    ks = jax.random.split(key, 10)

    def conv_w(k, cin, cout):
        # PyTorch Conv2d weight (cout, cin, 3, 3) -> kernel layout (3, 3, cin, cout) (HWIO)
        w = jax.random.normal(k, (cout, cin, 3, 3), dtype) * 0.05
        return jnp.transpose(w, (2, 3, 1, 0))

    def conv_b(k, cout):
        return jax.random.normal(k, (cout,), dtype) * 0.05

    return {
        'conv_w': conv_w(ks[0], in_dim, out_dim), 'conv_b': conv_b(ks[1], out_dim),
        'rb1_w1': conv_w(ks[2], out_dim, out_dim), 'rb1_b1': conv_b(ks[3], out_dim),
        'rb1_w2': conv_w(ks[4], out_dim, out_dim), 'rb1_b2': conv_b(ks[5], out_dim),
        'rb2_w1': conv_w(ks[6], out_dim, out_dim), 'rb2_b1': conv_b(ks[7], out_dim),
        'rb2_w2': conv_w(ks[8], out_dim, out_dim), 'rb2_b2': conv_b(ks[9], out_dim),
    }


# ------------------------------ pure-JAX reference ------------------------------

def _conv3x3_ref(x, w, b):
    y = jax.lax.conv_general_dilated(
        x, w, window_strides=(1, 1), padding=((1, 1), (1, 1)),
        dimension_numbers=('NHWC', 'HWIO', 'NHWC'),
        precision=jax.lax.Precision.HIGHEST)
    return y + b


def _refinement_ref(params, x_top_nchw, x_low_nchw):
    x_top = jnp.transpose(x_top_nchw, (0, 2, 3, 1))
    x_low = jnp.transpose(x_low_nchw, (0, 2, 3, 1))
    _, H, W, _ = x_low.shape
    y0 = _conv3x3_ref(x_low, params['conv_w'], params['conv_b'])
    t = _conv3x3_ref(jnp.maximum(y0, 0.0), params['rb1_w1'], params['rb1_b1'])
    y1 = y0 + _conv3x3_ref(jnp.maximum(t, 0.0), params['rb1_w2'], params['rb1_b2'])
    x = bilinear_upsample_nhwc(x_top, H, W) + y1
    u = _conv3x3_ref(jnp.maximum(x, 0.0), params['rb2_w1'], params['rb2_b1'])
    out = x + _conv3x3_ref(jnp.maximum(u, 0.0), params['rb2_w2'], params['rb2_b2'])
    return jnp.transpose(out, (0, 3, 1, 2))


if __name__ == "__main__":
    key = jax.random.PRNGKey(0)
    k_low, k_top, k_par = jax.random.split(key, 3)

    in_dim, out_dim = 4, 32            # small stand-in for the default out_dim=256
    N, H, W = 2, 16, 16                # x_low spatial size; x_top is half resolution

    x_low = jax.random.normal(k_low, (N, in_dim, H, W), jnp.float32)         # NCHW
    x_top = jax.random.normal(k_top, (N, out_dim, H // 2, W // 2), jnp.float32)

    params = init_params(k_par, in_dim, out_dim)

    # block_h=8 -> 2 row-bands per image, exercising the halo / border paths.
    out = refinement_module(params, x_top, x_low, block_h=8)
    out = jax.block_until_ready(out)
    assert out.shape == (N, out_dim, H, W) and out.dtype == jnp.float32

    ref = jax.block_until_ready(_refinement_ref(params, x_top, x_low))
    err = float(jnp.max(jnp.abs(out - ref)) / (jnp.max(jnp.abs(ref)) + 1e-6))
    assert err < 5e-2, f"kernel/reference mismatch: rel-to-max error {err}"

    print("KERNEL_OK")
</pallas_src>

<mosaic_0001>
module attributes {stable_mosaic.version = 11 : i64} {
  func.func @_fused_conv_kernel(%arg0: i32, %arg1: i32, %arg2: memref<1x2x16x4xf32, #tpu.memory_space<vmem>>, %arg3: memref<1x8x16x4xf32, #tpu.memory_space<vmem>>, %arg4: memref<1x2x16x4xf32, #tpu.memory_space<vmem>>, %arg5: memref<3x3x4x32xbf16, #tpu.memory_space<vmem>>, %arg6: memref<1x32xf32, #tpu.memory_space<vmem>>, %arg7: memref<1x8x16x32xf32, #tpu.memory_space<vmem>>, %arg8: memref<14x24x4xbf16, #tpu.memory_space<vmem>>) attributes {dimension_semantics = [#tpu.dimension_semantics<parallel>, #tpu.dimension_semantics<parallel>], iteration_bounds = array<i64: 2, 2>, scalar_prefetch = 0 : i64, scratch_operands = 1 : i64, tpu.core_type = #tpu.core_type<tc>, window_params = [{transform_indices = @transform_0, window_bounds = array<i64: 1, 2, 16, 4>}, {transform_indices = @transform_1, window_bounds = array<i64: 1, 8, 16, 4>}, {transform_indices = @transform_2, window_bounds = array<i64: 1, 2, 16, 4>}, {pipeline_mode = #tpu.pipeline_mode<synchronous>, transform_indices = @transform_3, window_bounds = array<i64: 3, 3, 4, 32>}, {pipeline_mode = #tpu.pipeline_mode<synchronous>, transform_indices = @transform_4, window_bounds = array<i64: 1, 32>}, {transform_indices = @transform_5, window_bounds = array<i64: 1, 8, 16, 32>}]} {
    %cst = arith.constant 0.000000e+00 : bf16
    %0 = vector.broadcast %cst : bf16 to vector<14x8x4xbf16>
    %c0 = arith.constant 0 : index
    %c16 = arith.constant 16 : index
    %c0_0 = arith.constant 0 : index
    %1 = vector.load %arg8[%c0, %c16, %c0_0] : memref<14x24x4xbf16, #tpu.memory_space<vmem>>, vector<14x8x4xbf16>
    tpu.vector_store %arg8[%c0, %c16, %c0_0], %0 {strides = array<i32>} : memref<14x24x4xbf16, #tpu.memory_space<vmem>>, vector<14x8x4xbf16>,
    %c0_i32 = arith.constant 0 : i32
    %2 = arith.cmpi eq, %arg1, %c0_i32 : i32
    %3 = arith.extui %2 : i1 to i32
    %c0_i32_1 = arith.constant 0 : i32
    %4 = arith.cmpi ne, %3, %c0_i32_1 : i32
    scf.if %4 {
      %cst_66 = arith.constant 0.000000e+00 : bf16
      %78 = vector.broadcast %cst_66 : bf16 to vector<2x16x4xbf16>
      %c1_67 = arith.constant 1 : index
      %c0_68 = arith.constant 0 : index
      %c0_69 = arith.constant 0 : index
      %79 = vector.load %arg8[%c1_67, %c0_68, %c0_69] : memref<14x24x4xbf16, #tpu.memory_space<vmem>>, vector<2x16x4xbf16>
      tpu.vector_store %arg8[%c1_67, %c0_68, %c0_69], %78 {strides = array<i32>} : memref<14x24x4xbf16, #tpu.memory_space<vmem>>, vector<2x16x4xbf16>,
    } else {
    }
    %c0_i32_2 = arith.constant 0 : i32
    %5 = arith.cmpi sgt, %arg1, %c0_i32_2 : i32
    %6 = arith.extui %5 : i1 to i32
    %c0_i32_3 = arith.constant 0 : i32
    %7 = arith.cmpi ne, %6, %c0_i32_3 : i32
    scf.if %7 {
      %c0_66 = arith.constant 0 : index
      %c0_67 = arith.constant 0 : index
      %c0_68 = arith.constant 0 : index
      %c0_69 = arith.constant 0 : index
      %78 = vector.load %arg2[%c0_66, %c0_67, %c0_68, %c0_69] : memref<1x2x16x4xf32, #tpu.memory_space<vmem>>, vector<1x2x16x4xf32>
      %79 = vector.shape_cast %78 : vector<1x2x16x4xf32> to vector<2x16x4xf32>
      %80 = arith.truncf %79 : vector<2x16x4xf32> to vector<2x16x4xbf16>
      %c1_70 = arith.constant 1 : index
      %c0_71 = arith.constant 0 : index
      %c0_72 = arith.constant 0 : index
      %81 = vector.load %arg8[%c1_70, %c0_71, %c0_72] : memref<14x24x4xbf16, #tpu.memory_space<vmem>>, vector<2x16x4xbf16>
      tpu.vector_store %arg8[%c1_70, %c0_71, %c0_72], %80 {strides = array<i32>} : memref<14x24x4xbf16, #tpu.memory_space<vmem>>, vector<2x16x4xbf16>,
    } else {
    }
    %c0_4 = arith.constant 0 : index
    %c0_5 = arith.constant 0 : index
    %c0_6 = arith.constant 0 : index
    %c0_7 = arith.constant 0 : index
    %8 = vector.load %arg3[%c0_4, %c0_5, %c0_6, %c0_7] : memref<1x8x16x4xf32, #tpu.memory_space<vmem>>, vector<1x8x16x4xf32>
    %9 = vector.shape_cast %8 : vector<1x8x16x4xf32> to vector<8x16x4xf32>
    %10 = arith.truncf %9 : vector<8x16x4xf32> to vector<8x16x4xbf16>
    %c3 = arith.constant 3 : index
    %c0_8 = arith.constant 0 : index
    %c0_9 = arith.constant 0 : index
    %11 = vector.load %arg8[%c3, %c0_8, %c0_9] : memref<14x24x4xbf16, #tpu.memory_space<vmem>>, vector<8x16x4xbf16>
    tpu.vector_store %arg8[%c3, %c0_8, %c0_9], %10 {strides = array<i32>} : memref<14x24x4xbf16, #tpu.memory_space<vmem>>, vector<8x16x4xbf16>,
    %c1_i32 = arith.constant 1 : i32
    %12 = arith.cmpi eq, %arg1, %c1_i32 : i32
    %13 = arith.extui %12 : i1 to i32
    %c0_i32_10 = arith.constant 0 : i32
    %14 = arith.cmpi ne, %13, %c0_i32_10 : i32
    scf.if %14 {
      %cst_66 = arith.constant 0.000000e+00 : bf16
      %78 = vector.broadcast %cst_66 : bf16 to vector<2x16x4xbf16>
      %c11 = arith.constant 11 : index
      %c0_67 = arith.constant 0 : index
      %c0_68 = arith.constant 0 : index
      %79 = vector.load %arg8[%c11, %c0_67, %c0_68] : memref<14x24x4xbf16, #tpu.memory_space<vmem>>, vector<2x16x4xbf16>
      tpu.vector_store %arg8[%c11, %c0_67, %c0_68], %78 {strides = array<i32>} : memref<14x24x4xbf16, #tpu.memory_space<vmem>>, vector<2x16x4xbf16>,
    } else {
    }
    %c1_i32_11 = arith.constant 1 : i32
    %15 = arith.cmpi slt, %arg1, %c1_i32_11 : i32
    %16 = arith.extui %15 : i1 to i32
    %c0_i32_12 = arith.constant 0 : i32
    %17 = arith.cmpi ne, %16, %c0_i32_12 : i32
    scf.if %17 {
      %c0_66 = arith.constant 0 : index
      %c0_67 = arith.constant 0 : index
      %c0_68 = arith.constant 0 : index
      %c0_69 = arith.constant 0 : index
      %78 = vector.load %arg4[%c0_66, %c0_67, %c0_68, %c0_69] : memref<1x2x16x4xf32, #tpu.memory_space<vmem>>, vector<1x2x16x4xf32>
      %79 = vector.shape_cast %78 : vector<1x2x16x4xf32> to vector<2x16x4xf32>
      %80 = arith.truncf %79 : vector<2x16x4xf32> to vector<2x16x4xbf16>
      %c11 = arith.constant 11 : index
      %c0_70 = arith.constant 0 : index
      %c0_71 = arith.constant 0 : index
      %81 = vector.load %arg8[%c11, %c0_70, %c0_71] : memref<14x24x4xbf16, #tpu.memory_space<vmem>>, vector<2x16x4xbf16>
      tpu.vector_store %arg8[%c11, %c0_70, %c0_71], %80 {strides = array<i32>} : memref<14x24x4xbf16, #tpu.memory_space<vmem>>, vector<2x16x4xbf16>,
    } else {
    }
    %c0_13 = arith.constant 0 : index
    %c0_14 = arith.constant 0 : index
    %c0_15 = arith.constant 0 : index
    %18 = vector.load %arg8[%c0_13, %c0_14, %c0_15] : memref<14x24x4xbf16, #tpu.memory_space<vmem>>, vector<14x24x4xbf16>
    %19 = vector.shape_cast %18 : vector<14x24x4xbf16> to vector<336x4xbf16>
    %cst_16 = arith.constant 0.000000e+00 : f32
    %20 = vector.broadcast %cst_16 : f32 to vector<192x32xf32>
    %21 = vector.extract_strided_slice %19 {offsets = [47, 0], sizes = [240, 4], strides = [1, 1]} : vector<336x4xbf16> to vector<240x4xbf16>
    %22 = vector.extract_strided_slice %21 {offsets = [0, 0], sizes = [192, 4], strides = [1, 1]} : vector<240x4xbf16> to vector<192x4xbf16>
    %c0_17 = arith.constant 0 : index
    %c0_18 = arith.constant 0 : index
    %c0_19 = arith.constant 0 : index
    %c0_20 = arith.constant 0 : index
    %23 = vector.load %arg5[%c0_17, %c0_18, %c0_19, %c0_20] : memref<3x3x4x32xbf16, #tpu.memory_space<vmem>>, vector<1x1x4x32xbf16>
    %24 = vector.shape_cast %23 : vector<1x1x4x32xbf16> to vector<4x32xbf16>
    %cst_21 = arith.constant dense<0.000000e+00> : vector<192x32xf32>
    %25 = tpu.matmul %22, %24, %cst_21 {dimension_numbers = #tpu.dot_dimension_numbers<[1], [0], [0], [1], [0, 0, 1, 1], [], []>} : vector<192x4xbf16>, vector<4x32xbf16>, vector<192x32xf32> -> vector<192x32xf32>
    %26 = arith.addf %20, %25 : vector<192x32xf32>
    %27 = vector.extract_strided_slice %21 {offsets = [24, 0], sizes = [192, 4], strides = [1, 1]} : vector<240x4xbf16> to vector<192x4xbf16>
    %c1 = arith.constant 1 : index
    %c0_22 = arith.constant 0 : index
    %c0_23 = arith.constant 0 : index
    %c0_24 = arith.constant 0 : index
    %28 = vector.load %arg5[%c1, %c0_22, %c0_23, %c0_24] : memref<3x3x4x32xbf16, #tpu.memory_space<vmem>>, vector<1x1x4x32xbf16>
    %29 = vector.shape_cast %28 : vector<1x1x4x32xbf16> to vector<4x32xbf16>
    %cst_25 = arith.constant dense<0.000000e+00> : vector<192x32xf32>
    %30 = tpu.matmul %27, %29, %cst_25 {dimension_numbers = #tpu.dot_dimension_numbers<[1], [0], [0], [1], [0, 0, 1, 1], [], []>} : vector<192x4xbf16>, vector<4x32xbf16>, vector<192x32xf32> -> vector<192x32xf32>
    %31 = arith.addf %26, %30 : vector<192x32xf32>
    %32 = vector.extract_strided_slice %21 {offsets = [48, 0], sizes = [192, 4], strides = [1, 1]} : vector<240x4xbf16> to vector<192x4xbf16>
    %c2 = arith.constant 2 : index
    %c0_26 = arith.constant 0 : index
    %c0_27 = arith.constant 0 : index
    %c0_28 = arith.constant 0 : index
    %33 = vector.load %arg5[%c2, %c0_26, %c0_27, %c0_28] : memref<3x3x4x32xbf16, #tpu.memory_space<vmem>>, vector<1x1x4x32xbf16>
    %34 = vector.shape_cast %33 : vector<1x1x4x32xbf16> to vector<4x32xbf16>
    %cst_29 = arith.constant dense<0.000000e+00> : vector<192x32xf32>
    %35 = tpu.matmul %32, %34, %cst_29 {dimension_numbers = #tpu.dot_dimension_numbers<[1], [0], [0], [1], [0, 0, 1, 1], [], []>} : vector<192x4xbf16>, vector<4x32xbf16>, vector<192x32xf32> -> vector<192x32xf32>
    %36 = arith.addf %31, %35 : vector<192x32xf32>
    %37 = vector.extract_strided_slice %19 {offsets = [48, 0], sizes = [240, 4], strides = [1, 1]} : vector<336x4xbf16> to vector<240x4xbf16>
    %38 = vector.extract_strided_slice %37 {offsets = [0, 0], sizes = [192, 4], strides = [1, 1]} : vector<240x4xbf16> to vector<192x4xbf16>
    %c0_30 = arith.constant 0 : index
    %c1_31 = arith.constant 1 : index
    %c0_32 = arith.constant 0 : index
    %c0_33 = arith.constant 0 : index
    %39 = vector.load %arg5[%c0_30, %c1_31, %c0_32, %c0_33] : memref<3x3x4x32xbf16, #tpu.memory_space<vmem>>, vector<1x1x4x32xbf16>
    %40 = vector.shape_cast %39 : vector<1x1x4x32xbf16> to vector<4x32xbf16>
    %cst_34 = arith.constant dense<0.000000e+00> : vector<192x32xf32>
    %41 = tpu.matmul %38, %40, %cst_34 {dimension_numbers = #tpu.dot_dimension_numbers<[1], [0], [0], [1], [0, 0, 1, 1], [], []>} : vector<192x4xbf16>, vector<4x32xbf16>, vector<192x32xf32> -> vector<192x32xf32>
    %42 = arith.addf %36, %41 : vector<192x32xf32>
    %43 = vector.extract_strided_slice %37 {offsets = [24, 0], sizes = [192, 4], strides = [1, 1]} : vector<240x4xbf16> to vector<192x4xbf16>
    %c1_35 = arith.constant 1 : index
    %c1_36 = arith.constant 1 : index
    %c0_37 = arith.constant 0 : index
    %c0_38 = arith.constant 0 : index
    %44 = vector.load %arg5[%c1_35, %c1_36, %c0_37, %c0_38] : memref<3x3x4x32xbf16, #tpu.memory_space<vmem>>, vector<1x1x4x32xbf16>
    %45 = vector.shape_cast %44 : vector<1x1x4x32xbf16> to vector<4x32xbf16>
    %cst_39 = arith.constant dense<0.000000e+00> : vector<192x32xf32>
    %46 = tpu.matmul %43, %45, %cst_39 {dimension_numbers = #tpu.dot_dimension_numbers<[1], [0], [0], [1], [0, 0, 1, 1], [], []>} : vector<192x4xbf16>, vector<4x32xbf16>, vector<192x32xf32> -> vector<192x32xf32>
    %47 = arith.addf %42, %46 : vector<192x32xf32>
    %48 = vector.extract_strided_slice %37 {offsets = [48, 0], sizes = [192, 4], strides = [1, 1]} : vector<240x4xbf16> to vector<192x4xbf16>
    %c2_40 = arith.constant 2 : index
    %c1_41 = arith.constant 1 : index
    %c0_42 = arith.constant 0 : index
    %c0_43 = arith.constant 0 : index
    %49 = vector.load %arg5[%c2_40, %c1_41, %c0_42, %c0_43] : memref<3x3x4x32xbf16, #tpu.memory_space<vmem>>, vector<1x1x4x32xbf16>
    %50 = vector.shape_cast %49 : vector<1x1x4x32xbf16> to vector<4x32xbf16>
    %cst_44 = arith.constant dense<0.000000e+00> : vector<192x32xf32>
    %51 = tpu.matmul %48, %50, %cst_44 {dimension_numbers = #tpu.dot_dimension_numbers<[1], [0], [0], [1], [0, 0, 1, 1], [], []>} : vector<192x4xbf16>, vector<4x32xbf16>, vector<192x32xf32> -> vector<192x32xf32>
    %52 = arith.addf %47, %51 : vector<192x32xf32>
    %53 = vector.extract_strided_slice %19 {offsets = [49, 0], sizes = [240, 4], strides = [1, 1]} : vector<336x4xbf16> to vector<240x4xbf16>
    %54 = vector.extract_strided_slice %53 {offsets = [0, 0], sizes = [192, 4], strides = [1, 1]} : vector<240x4xbf16> to vector<192x4xbf16>
    %c0_45 = arith.constant 0 : index
    %c2_46 = arith.constant 2 : index
    %c0_47 = arith.constant 0 : index
    %c0_48 = arith.constant 0 : index
    %55 = vector.load %arg5[%c0_45, %c2_46, %c0_47, %c0_48] : memref<3x3x4x32xbf16, #tpu.memory_space<vmem>>, vector<1x1x4x32xbf16>
    %56 = vector.shape_cast %55 : vector<1x1x4x32xbf16> to vector<4x32xbf16>
    %cst_49 = arith.constant dense<0.000000e+00> : vector<192x32xf32>
    %57 = tpu.matmul %54, %56, %cst_49 {dimension_numbers = #tpu.dot_dimension_numbers<[1], [0], [0], [1], [0, 0, 1, 1], [], []>} : vector<192x4xbf16>, vector<4x32xbf16>, vector<192x32xf32> -> vector<192x32xf32>
    %58 = arith.addf %52, %57 : vector<192x32xf32>
    %59 = vector.extract_strided_slice %53 {offsets = [24, 0], sizes = [192, 4], strides = [1, 1]} : vector<240x4xbf16> to vector<192x4xbf16>
    %c1_50 = arith.constant 1 : index
    %c2_51 = arith.constant 2 : index
    %c0_52 = arith.constant 0 : index
    %c0_53 = arith.constant 0 : index
    %60 = vector.load %arg5[%c1_50, %c2_51, %c0_52, %c0_53] : memref<3x3x4x32xbf16, #tpu.memory_space<vmem>>, vector<1x1x4x32xbf16>
    %61 = vector.shape_cast %60 : vector<1x1x4x32xbf16> to vector<4x32xbf16>
    %cst_54 = arith.constant dense<0.000000e+00> : vector<192x32xf32>
    %62 = tpu.matmul %59, %61, %cst_54 {dimension_numbers = #tpu.dot_dimension_numbers<[1], [0], [0], [1], [0, 0, 1, 1], [], []>} : vector<192x4xbf16>, vector<4x32xbf16>, vector<192x32xf32> -> vector<192x32xf32>
    %63 = arith.addf %58, %62 : vector<192x32xf32>
    %64 = vector.extract_strided_slice %53 {offsets = [48, 0], sizes = [192, 4], strides = [1, 1]} : vector<240x4xbf16> to vector<192x4xbf16>
    %c2_55 = arith.constant 2 : index
    %c2_56 = arith.constant 2 : index
    %c0_57 = arith.constant 0 : index
    %c0_58 = arith.constant 0 : index
    %65 = vector.load %arg5[%c2_55, %c2_56, %c0_57, %c0_58] : memref<3x3x4x32xbf16, #tpu.memory_space<vmem>>, vector<1x1x4x32xbf16>
    %66 = vector.shape_cast %65 : vector<1x1x4x32xbf16> to vector<4x32xbf16>
    %cst_59 = arith.constant dense<0.000000e+00> : vector<192x32xf32>
    %67 = tpu.matmul %64, %66, %cst_59 {dimension_numbers = #tpu.dot_dimension_numbers<[1], [0], [0], [1], [0, 0, 1, 1], [], []>} : vector<192x4xbf16>, vector<4x32xbf16>, vector<192x32xf32> -> vector<192x32xf32>
    %68 = arith.addf %63, %67 : vector<192x32xf32>
    %69 = vector.shape_cast %68 : vector<192x32xf32> to vector<8x24x32xf32>
    %70 = vector.extract_strided_slice %69 {offsets = [0, 0, 0], sizes = [8, 16, 32], strides = [1, 1, 1]} : vector<8x24x32xf32> to vector<8x16x32xf32>
    %c0_60 = arith.constant 0 : index
    %c0_61 = arith.constant 0 : index
    %71 = vector.load %arg6[%c0_60, %c0_61] : memref<1x32xf32, #tpu.memory_space<vmem>>, vector<1x32xf32>
    %72 = vector.shape_cast %71 : vector<1x32xf32> to vector<1x1x32xf32>
    %73 = vector.broadcast %72 : vector<1x1x32xf32> to vector<8x16x32xf32>
    %74 = arith.addf %70, %73 : vector<8x16x32xf32>
    %c0_62 = arith.constant 0 : index
    %c0_63 = arith.constant 0 : index
    %c0_64 = arith.constant 0 : index
    %c0_65 = arith.constant 0 : index
    %75 = vector.load %arg7[%c0_62, %c0_63, %c0_64, %c0_65] : memref<1x8x16x32xf32, #tpu.memory_space<vmem>>, vector<1x8x16x32xf32>
    %76 = vector.shape_cast %75 : vector<1x8x16x32xf32> to vector<8x16x32xf32>
    %77 = vector.shape_cast %74 : vector<8x16x32xf32> to vector<1x8x16x32xf32>
    tpu.vector_store %arg7[%c0_62, %c0_63, %c0_64, %c0_65], %77 {strides = array<i32>} : memref<1x8x16x32xf32, #tpu.memory_space<vmem>>, vector<1x8x16x32xf32>,
    return
  }
  func.func @transform_0(%arg0: i32, %arg1: i32) -> (i32, i32, i32, i32) {
    %c4_i32 = arith.constant 4 : i32
    %0 = arith.muli %arg1, %c4_i32 : i32
    %c1_i32 = arith.constant 1 : i32
    %1 = arith.subi %0, %c1_i32 : i32
    %c0_i32 = arith.constant 0 : i32
    %2 = arith.maxsi %1, %c0_i32 : i32
    %c0_i32_0 = arith.constant 0 : i32
    %c0_i32_1 = arith.constant 0 : i32
    %c0_i32_2 = arith.constant 0 : i32
    return %arg0, %2, %c0_i32_0, %c0_i32_1 : i32, i32, i32, i32
  }
  func.func @transform_1(%arg0: i32, %arg1: i32) -> (i32, i32, i32, i32) {
    %c0_i32 = arith.constant 0 : i32
    %c0_i32_0 = arith.constant 0 : i32
    %c0_i32_1 = arith.constant 0 : i32
    return %arg0, %arg1, %c0_i32, %c0_i32_0 : i32, i32, i32, i32
  }
  func.func @transform_2(%arg0: i32, %arg1: i32) -> (i32, i32, i32, i32) {
    %c4_i32 = arith.constant 4 : i32
    %0 = arith.muli %arg1, %c4_i32 : i32
    %c4_i32_0 = arith.constant 4 : i32
    %1 = arith.addi %0, %c4_i32_0 : i32
    %c7_i32 = arith.constant 7 : i32
    %2 = arith.minsi %1, %c7_i32 : i32
    %c0_i32 = arith.constant 0 : i32
    %c0_i32_1 = arith.constant 0 : i32
    %c0_i32_2 = arith.constant 0 : i32
    return %arg0, %2, %c0_i32, %c0_i32_1 : i32, i32, i32, i32
  }
  func.func @transform_3(%arg0: i32, %arg1: i32) -> (i32, i32, i32, i32) {
    %c0_i32 = arith.constant 0 : i32
    %c0_i32_0 = arith.constant 0 : i32
    %c0_i32_1 = arith.constant 0 : i32
    %c0_i32_2 = arith.constant 0 : i32
    %c0_i32_3 = arith.constant 0 : i32
    return %c0_i32, %c0_i32_0, %c0_i32_1, %c0_i32_2 : i32, i32, i32, i32
  }
  func.func @transform_4(%arg0: i32, %arg1: i32) -> (i32, i32) {
    %c0_i32 = arith.constant 0 : i32
    %c0_i32_0 = arith.constant 0 : i32
    %c0_i32_1 = arith.constant 0 : i32
    return %c0_i32, %c0_i32_0 : i32, i32
  }
  func.func @transform_5(%arg0: i32, %arg1: i32) -> (i32, i32, i32, i32) {
    %c0_i32 = arith.constant 0 : i32
    %c0_i32_0 = arith.constant 0 : i32
    %c0_i32_1 = arith.constant 0 : i32
    return %arg0, %arg1, %c0_i32, %c0_i32_0 : i32, i32, i32, i32
  }
}

</mosaic_0001>

<bundles_post_ra>
// kernel: tpu_custom_call.1
= control target key start
LH: loop header
LB: loop body
LE: loop exit
PB: predicated region body
PF: predicated region fallthrough
CT: control target
= control target key end

     0   :  { %10 = vsyncpa [#allocation4], 0  ;;  %s4850_s0 = inlined_call_operand.vmem [shape: f32[2,16,16,4], index: 0, kind: input, shape index: {}]   ;;  %s4851_s1 = inlined_call_operand.vmem [shape: f32[2,16,16,4], index: 1, kind: input, shape index: {}]   ;;  %s4852_s2 = inlined_call_operand.vmem [shape: f32[2,16,16,4], index: 2, kind: input, shape index: {}]   ;;  %s4853_s3 = inlined_call_operand.vmem [shape: bf16[3,3,4,32], index: 3, kind: input, shape index: {}]   ;;  %s4854_s4 = inlined_call_operand.vmem [shape: f32[1,32], index: 4, kind: input, shape index: {}]   ;;  %s4855_s5 = inlined_call_operand.hbm [shape: f32[2,16,16,32], index: 5, kind: output, shape index: {}]  }
   0x1   :  { %12 = vsyncpa [#allocation4 + $0x1], 0  ;;  %s3591_s18 = smov 0   ;;  %s3593_s19 = smov 0  }
   0x2   :  { %s3595_s20 = smov 0   ;;  %s3597_s21 = smov 0  }
   0x3   :  { %s3599_s22 = smov 0   ;;  %s3601_s23 = smov 0  }
   0x4   :  { %s3603_s24 = smov 0   ;;  %s3605_s25 = smov 0  }
   0x5 LB: > { %4914 = sst [smem:[#allocation6_spill]] %s3533_s20  ;;  %s2744_s26 = sadd.s32 4294967295, %s3553_s25   ;;  %s3553_s25 = sphi %s3605_s25, %s18_s25   ;;  %s3549_s24 = sphi %s3603_s24, %s4995_s24   ;;  %s3545_s23 = sphi %s3601_s23, %s4994_s23   ;;  %s3541_s22 = sphi %s3599_s22, %s4993_s22   ;;  %s3537_s21 = sphi %s3597_s21, %s4992_s21   ;;  %s3533_s20 = sphi %s3595_s20, %s4991_s20   ;;  %s3529_s19 = sphi %s3593_s19, %s4997_s19   ;;  %s3525_s18 = sphi %s3591_s18, %s4996_s18  }
   0x6   : > { %4915 = sst [smem:[#allocation7_spill]] %s3545_s23  ;;  %s2745_s27 = sadd.s32 4294967294, %s3553_s25  }
   0x7   : > { %4916 = sst [smem:[#allocation8_spill]] %s3549_s24  ;;  %s27_s28 = sadd.s32 1, %s3545_s23 }
   0x8   : > { %p28_p0 = scmp.ge.s32.totalorder %s27_s28, 2  ;;  %s30_s29 = sadd.s32 1, %s3549_s24 }
   0x9   : > { %p191_p1 = scmp.ne.s32.totalorder %s3533_s20, %s3529_s19  ;;  %p192_p2 = scmp.eq.s32.totalorder %s2744_s26, 3 }
   0xa   : > { %s4999_s28 = smov (%p28_p0, %s27_s28), 0  ;;  %s5001_s29 = smov (!%p28_p0, %s30_s29), %s3549_s24 }
   0xb   : > { %4917 = sst [smem:[#allocation9_spill]] %s4999_s28  ;;  %s177_s30 = ssub.s32 %s3545_s23, %s4999_s28 }
   0xc   : > { %p3642_p3 = por %p192_p2, %p191_p1  ;;  %p32_p4 = scmp.ge.s32.totalorder %s5001_s29, 2 }
   0xd   : > { %p197_p5 = scmp.ne.s32.totalorder %s3529_s19, %s3525_s18  ;;  %p198_p6 = scmp.eq.s32.totalorder %s2745_s27, 3 }
   0xe   : > { %p2754_p7 = scmp.ge.s32.totalorder %s3553_s25, 1  ;;  %s5003_s29 = smov (%p32_p4, %s5001_s29), 0 }
   0xf   : > { %4919 = sst [smem:[#allocation10_spill]] %s5003_s29  ;;  %p3651_p8 = por %p198_p6, %p197_p5 }
  0x10   : > { %p280_p9 = scmp.lt.s32.totalorder %s3553_s25, 5  ;;  %s176_s8 = ssub.s32 %s3549_s24, %s5003_s29 }
  0x11   : > { %s4920_s7 = scalar_select %p3651_p8, 1, 0 }
  0x12   : > { %s181_s9 = sadd.s32 1, %s3533_s20  ;;  %s178_s10 = sor.u32 %s177_s30, %s176_s8 }
  0x13   : > { %4921 = sst [smem:[#allocation11_spill]] %s4920_s7  ;;  %p281_p10 = pnand %p2754_p7, %p280_p9 }
  0x14   : > { %p179_p11 = scmp.eq.s32.totalorder %s178_s10, 0 }
  0x15   : > { %284 = sbr.rel (%p281_p10) target bundleno = 546 (0x222), region = 40 }
  0x16   : > { %s3660_s11 = scalar_select %p179_p11, %s3533_s20, %s181_s9  }
  0x18   : > { %4922 = sst [smem:[#allocation12_spill]] %s3660_s11 }
  0x1c   : > { %s4856_s12 = sand.u32 1, %s3529_s19   ;;  %s2756_s13 = sshll.u32 %s3537_s21, 2  ;;  %vm392_vm0 = vcmask 27648   ;;  %v3555_v0 = vmov 0  }
  0x1d   : > { %s3666_s14 = sshll.u32 %s4856_s12, 7  ;;  %s2757_s15 = sadd.s32 4294967295, %s2756_s13  ;;  %394 = vst.msk [vmem:[#allocation2 + $0x14] sm:$0xf] %vm392_vm0, %v3555_v0  ;;  %395 = vst.msk [vmem:[#allocation2 + $0x20] sm:$0xf] %vm392_vm0, %v3555_v0 }
  0x1e   : > { %396 = vst.msk [vmem:[#allocation2 + $0x2c] sm:$0xf] %vm392_vm0, %v3555_v0  ;;  %397 = vst.msk [vmem:[#allocation2 + $0x38] sm:$0xf] %vm392_vm0, %v3555_v0  ;;  %p343_p12 = scmp.gt.s32.totalorder %s2757_s15, 0  ;;  %p346_p13 = scmp.lt.s32.totalorder %s3541_s22, 1 }
  0x1f   : > { %398 = vst.msk [vmem:[#allocation2 + $0x44] sm:$0xf] %vm392_vm0, %v3555_v0  ;;  %399 = vst.msk [vmem:[#allocation2 + $0x50] sm:$0xf] %vm392_vm0, %v3555_v0  ;;  %s2762_s16 = sshll.u32 %s3537_s21, 3  ;;  %s372_s8 = sadd.s32 4, %s2756_s13 }
  0x20   : > { %400 = vst.msk [vmem:[#allocation2 + $0x5c] sm:$0xf] %vm392_vm0, %v3555_v0  ;;  %401 = vst.msk [vmem:[#allocation2 + $0x68] sm:$0xf] %vm392_vm0, %v3555_v0  ;;  %s5005_s15 = smov (!%p343_p12, %s2757_s15), 0  ;;  %p363_p0 = scmp.lt.s32.totalorder %s2762_s16, 15 }
  0x21   : > { %402 = vst.msk [vmem:[#allocation2 + $0x74] sm:$0xf] %vm392_vm0, %v3555_v0  ;;  %403 = vst.msk [vmem:[#allocation2 + $0x80] sm:$0xf] %vm392_vm0, %v3555_v0  ;;  %s347_s17 = scalar_select %p346_p13, %s3541_s22, 1 }
  0x22   : > { %404 = vst.msk [vmem:[#allocation2 + $0x8c] sm:$0xf] %vm392_vm0, %v3555_v0  ;;  %s2758_s26 = sshll.u32 %s5005_s15, 1  ;;  %s5007_s16 = smov (!%p363_p0, %s2762_s16), 15 }
  0x23   : > { %p348_p1 = scmp.lt.s32.totalorder %s2758_s26, 15  ;;  %s2760_s27 = sshll.u32 %s347_s17, 5 }
  0x24   : > { %s2763_s30 = sshll.u32 %s5007_s16, 1  ;;  %p373_p2 = scmp.lt.s32.totalorder %s372_s8, 7 }
  0x25   : > { %s5009_s26 = smov (!%p348_p1, %s2758_s26), 15  ;;  %s367_s10 = sadd.s32 %s2763_s30, %s2760_s27 }
  0x26   : > { %s2759_s9 = sshll.u32 %s5009_s26, 1  ;;  %s2765_s29 = sshll.u32 %s367_s10, 3 }
  0x27   : > { %s352_s12 = sadd.s32 %s2760_s27, %s2759_s9  ;;  %s3685_s11 = scalar_lea.vmem %s4851_s1, %s2765_s29 }
  0x28   : > { %s2761_s28 = sshll.u32 %s352_s12, 3  ;;  %s5011_s8 = smov (!%p373_p2, %s372_s8), 7 }
  0x29   : > { %s354_s7 = scalar_lea.vmem %s4850_s0, %s2761_s28  ;;  %s2767_s17 = sshll.u32 %s5011_s8, 1 }
  0x2a   : > { %p378_p4 = scmp.lt.s32.totalorder %s2767_s17, 15  ;;  %s3696_s23 = scalar_lea.vmem [#allocation3], %s3666_s14 }
  0x2b   : > { %p2771_p5 = scmp.ne.s32.totalorder %s3537_s21, 0 }
  0x2c   : > { %s5013_s17 = smov (!%p378_p4, %s2767_s17), 15  ;;  %v3556_v1 = vmov (!%p2771_p5), 0  }
  0x2d   : > { %s2768_s13 = sshll.u32 %s5013_s17, 1  ;;  %410 = sbr.rel (%p2771_p5) target bundleno = 52 (0x34), region = 44  ;;  %414 = vst.msk [vmem:[#allocation2 + $0x18] sm:$0xf] (!%p2771_p5), %vm392_vm0, %v3556_v1  ;;  %415 = vst.msk [vmem:[#allocation2 + $0x1c] sm:$0xf] (!%p2771_p5), %vm392_vm0, %v3556_v1 }
  0x2e   : > { %s382_s16 = sadd.s32 %s2768_s13, %s2760_s27 }
  0x2f   : > { %s2770_s26 = sshll.u32 %s382_s16, 3 }
  0x30   : > { %s3693_s12 = scalar_lea.vmem %s4852_s2, %s2770_s26 }
  0x34 PF: > { %p2772_p6 = scmp.le.s32.totalorder %s3537_s21, 0 }
  0x35   : > { %v422_v2 = vld [vmem:[%s354_s7 + $0x10] sm:$0xff] (!%p2772_p6)  ;;  %v423_v4 = vld [vmem:[%s354_s7 + $0x18] sm:$0xff] (!%p2772_p6) }
  0x36   : > { %419 = sbr.rel (%p2772_p6) target bundleno = 61 (0x3d), region = 48  ;;  %v2961_v3 = vpack.c.bf16 (!%p2772_p6), %v422_v2, %v422_v2  ;;  %v2962_v5 = vpack.c.bf16 (!%p2772_p6), %v423_v4, %v423_v4 }
  0x38   : > { %443 = vst.msk [vmem:[#allocation2 + $0x18] sm:$0xf] (!%p2772_p6), %vm392_vm0, %v2961_v3  ;;  %444 = vst.msk [vmem:[#allocation2 + $0x1c] sm:$0xf] (!%p2772_p6), %vm392_vm0, %v2962_v5 }
  0x3d PF: > { %v445_v6 = vld [vmem:[%s3685_s11] sm:$0xff]  ;;  %v446_v7 = vld [vmem:[%s3685_s11 + $0x8] sm:$0xff]  ;;  %v447_v8 = vld [vmem:[%s3685_s11 + $0x10] sm:$0xff]  ;;  %p2793_p7 = scmp.ne.s32.totalorder %s3537_s21, 1 }
  0x3e   : > { %v2963_v9 = vpack.c.bf16 %v445_v6, %v445_v6  ;;  %v2964_v10 = vpack.c.bf16 %v446_v7, %v446_v7  ;;  %v2965_v11 = vpack.c.bf16 %v447_v8, %v447_v8  ;;  %v448_v12 = vld [vmem:[%s3685_s11 + $0x18] sm:$0xff]  ;;  %v449_v13 = vld [vmem:[%s3685_s11 + $0x20] sm:$0xff]  ;;  %v450_v14 = vld [vmem:[%s3685_s11 + $0x28] sm:$0xff]  ;;  %v3557_v38 = vmov (!%p2793_p7), 0  }
  0x3f   : > { %v2966_v15 = vpack.c.bf16 %v448_v12, %v448_v12  ;;  %v2967_v16 = vpack.c.bf16 %v449_v13, %v449_v13  ;;  %v2968_v17 = vpack.c.bf16 %v450_v14, %v450_v14  ;;  %v451_v18 = vld [vmem:[%s3685_s11 + $0x30] sm:$0xff]  ;;  %v452_v19 = vld [vmem:[%s3685_s11 + $0x38] sm:$0xff]  ;;  %v453_v20 = vld [vmem:[%s3685_s11 + $0x40] sm:$0xff]  ;;  %547 = vst.msk [vmem:[#allocation2 + $0x84] sm:$0xf] (!%p2793_p7), %vm392_vm0, %v3557_v38 }
  0x40   : > { %526 = vst.msk [vmem:[#allocation2 + $0x24] sm:$0xf] %vm392_vm0, %v2963_v9  ;;  %527 = vst.msk [vmem:[#allocation2 + $0x28] sm:$0xf] %vm392_vm0, %v2964_v10  ;;  %v2969_v21 = vpack.c.bf16 %v451_v18, %v451_v18  ;;  %v2970_v22 = vpack.c.bf16 %v452_v19, %v452_v19  ;;  %v2971_v23 = vpack.c.bf16 %v453_v20, %v453_v20  ;;  %v454_v24 = vld [vmem:[%s3685_s11 + $0x48] sm:$0xff]  ;;  %v455_v25 = vld [vmem:[%s3685_s11 + $0x50] sm:$0xff] }
  0x41   : > { %528 = vst.msk [vmem:[#allocation2 + $0x30] sm:$0xf] %vm392_vm0, %v2965_v11  ;;  %v456_v26 = vld [vmem:[%s3685_s11 + $0x58] sm:$0xff]  ;;  %529 = vst.msk [vmem:[#allocation2 + $0x34] sm:$0xf] %vm392_vm0, %v2966_v15  ;;  %v2972_v27 = vpack.c.bf16 %v454_v24, %v454_v24  ;;  %v2973_v28 = vpack.c.bf16 %v455_v25, %v455_v25  ;;  %v457_v30 = vld [vmem:[%s3685_s11 + $0x60] sm:$0xff] }
  0x42   : > { %530 = vst.msk [vmem:[#allocation2 + $0x3c] sm:$0xf] %vm392_vm0, %v2967_v16  ;;  %531 = vst.msk [vmem:[#allocation2 + $0x40] sm:$0xf] %vm392_vm0, %v2968_v17  ;;  %v2974_v29 = vpack.c.bf16 %v456_v26, %v456_v26  ;;  %v458_v31 = vld [vmem:[%s3685_s11 + $0x68] sm:$0xff]  ;;  %v459_v32 = vld [vmem:[%s3685_s11 + $0x70] sm:$0xff]  ;;  %v2975_v33 = vpack.c.bf16 %v457_v30, %v457_v30 }
  0x43   : > { %532 = vst.msk [vmem:[#allocation2 + $0x48] sm:$0xf] %vm392_vm0, %v2969_v21  ;;  %533 = vst.msk [vmem:[#allocation2 + $0x4c] sm:$0xf] %vm392_vm0, %v2970_v22  ;;  %v2976_v34 = vpack.c.bf16 %v458_v31, %v458_v31  ;;  %v2977_v35 = vpack.c.bf16 %v459_v32, %v459_v32  ;;  %v460_v36 = vld [vmem:[%s3685_s11 + $0x78] sm:$0xff]  ;;  %545 = sbr.rel (%p2793_p7) target bundleno = 74 (0x4a), region = 52 }
  0x44   : > { %534 = vst.msk [vmem:[#allocation2 + $0x54] sm:$0xf] %vm392_vm0, %v2971_v23  ;;  %535 = vst.msk [vmem:[#allocation2 + $0x58] sm:$0xf] %vm392_vm0, %v2972_v27  ;;  %v2978_v37 = vpack.c.bf16 %v460_v36, %v460_v36 }
  0x45   : > { %536 = vst.msk [vmem:[#allocation2 + $0x60] sm:$0xf] %vm392_vm0, %v2973_v28  ;;  %537 = vst.msk [vmem:[#allocation2 + $0x64] sm:$0xf] %vm392_vm0, %v2974_v29 }
  0x46   : > { %538 = vst.msk [vmem:[#allocation2 + $0x6c] sm:$0xf] %vm392_vm0, %v2975_v33  ;;  %539 = vst.msk [vmem:[#allocation2 + $0x70] sm:$0xf] %vm392_vm0, %v2976_v34 }
  0x47   : > { %540 = vst.msk [vmem:[#allocation2 + $0x78] sm:$0xf] %vm392_vm0, %v2977_v35  ;;  %541 = vst.msk [vmem:[#allocation2 + $0x7c] sm:$0xf] %vm392_vm0, %v2978_v37 }
  0x48   : > { %548 = vst.msk [vmem:[#allocation2 + $0x88] sm:$0xf] (!%p2793_p7), %vm392_vm0, %v3557_v38  ;;  %549 = vst.msk [vmem:[#allocation2 + $0x90] sm:$0xf] (!%p2793_p7), %vm392_vm0, %v3557_v38 }
  0x4a PF: > { %p2794_p9 = scmp.ge.s32.totalorder %s3537_s21, 1 }
  0x4b   : > { %v555_v39 = vld [vmem:[%s3693_s12] sm:$0xff] (!%p2794_p9)  ;;  %v556_v40 = vld [vmem:[%s3693_s12 + $0x8] sm:$0xff] (!%p2794_p9)  ;;  %v557_v41 = vld [vmem:[%s3693_s12 + $0x10] sm:$0xff] (!%p2794_p9) }
  0x4c   : > { %554 = sbr.rel (%p2794_p9) target bundleno = 83 (0x53), region = 56  ;;  %v2979_v42 = vpack.c.bf16 (!%p2794_p9), %v555_v39, %v555_v39  ;;  %v2980_v43 = vpack.c.bf16 (!%p2794_p9), %v556_v40, %v556_v40  ;;  %v2981_v44 = vpack.c.bf16 (!%p2794_p9), %v557_v41, %v557_v41 }
  0x4e   : > { %576 = vst.msk [vmem:[#allocation2 + $0x84] sm:$0xf] (!%p2794_p9), %vm392_vm0, %v2979_v42  ;;  %577 = vst.msk [vmem:[#allocation2 + $0x88] sm:$0xf] (!%p2794_p9), %vm392_vm0, %v2980_v43 }
  0x4f   : > { %578 = vst.msk [vmem:[#allocation2 + $0x90] sm:$0xf] (!%p2794_p9), %vm392_vm0, %v2981_v44 }
  0x53 PF: > { %v2799_v45 = vld [vmem:[%s4853_s3 + $0x6] sm:$0x3]  ;;  %vm832_vm1 = vcmask 1041408   ;;  %v3750_v46 = vld [vmem:[#allocation2 + $0x20] sm:$0xf]  ;;  %vm795_vm2 = vcmask 31744  }
  0x54   : > { %3338 = vmatprep.subr.msk.bf16.mxu1 %vm832_vm1, %v2799_v45  ;;  %3337 = vmatprep.subr.msk.bf16.mxu0 %vm832_vm1, %v2799_v45  ;;  %v834_v47 = vsel %vm832_vm1, %v2799_v45, 0  ;;  %v584_v48 = vld [vmem:[#allocation2 + $0x24] sm:$0xf]  ;;  %v585_v49 = vld [vmem:[#allocation2 + $0x28] sm:$0xf]  ;;  %vm2583_vm5 = vcmask 261120  }
  0x55   : > { %3336 = vmatpush3.bf16.msra.mxu1 %v834_v47  ;;  %3102 = vmatpush3.bf16.msra.mxu0 %v834_v47  ;;  %v586_v50 = vld [vmem:[#allocation2 + $0x2c] sm:$0xf]  ;;  %v587_v51 = vld [vmem:[#allocation2 + $0x30] sm:$0xf]  ;;  %v3755_v52 = vld [vmem:[#allocation2 + $0x34] sm:$0xf]  ;;  %v3758_v53 = vcombine.low %v3750_v46, %v584_v48  ;;  %v3771_v60 = vcombine.low %v584_v48, %v585_v49 }
  0x56   : > { %v3760_v54 = vcombine.low %v585_v49, %v586_v50  ;;  %v3763_v55 = vcombine.low %v587_v51, %v3755_v52  ;;  %vm678_vm3 = vsmask.f32 4352  ;;  %v3765_v56 = vld [vmem:[#allocation2 + $0x50] sm:$0xf]  ;;  %v3767_v57 = vld [vmem:[#allocation2 + $0x54] sm:$0xf]  ;;  %v3804_v12 = vcombine.low %v586_v50, %v587_v51 }
  0x57   : > { %v680_v58 = vshrl.u32 %v3758_v53, 16  ;;  %v683_v59 = vshll.u32 %v3758_v53, 16  ;;  %v3773_v61 = vld [vmem:[#allocation2 + $0x58] sm:$0xf]  ;;  %v3775_v62 = vld [vmem:[#allocation2 + $0x5c] sm:$0xf]  ;;  %v3779_v63 = vcombine.low %v3765_v56, %v3767_v57 }
  0x58   : > { %v4907_v0 = vshrl.u32 %v3760_v54, 16  ;;  %v691_v1 = vshll.u32 %v3760_v54, 16  ;;  %v3785_v2 = vcombine.low %v3773_v61, %v3775_v62  ;;  %v612_v3 = vld [vmem:[%s4853_s3] sm:$0x3]  ;;  %v4872_v4 = vshrl.u32 %v3763_v55, 16  ;;  %s2983_s28 = sshll.u32 %s3537_s21, 4 }
  0x59   : > { %v682_v5 = vrot.slane %v680_v58, 3  ;;  %v685_v6 = vrot.slane %v683_v59, 4  ;;  %v4869_v7 = vshrl.u32 %v3779_v63, 16  ;;  %v4875_v8 = vshll.u32 %v3779_v63, 16  ;;  %3339 = vmatprep.subr.msk.bf16.mxu1 %vm832_vm1, %v612_v3  ;;  %v3798_v9 = vld [vmem:[#allocation2 + $0x60] sm:$0xf] }
  0x5a   : > { %v690_v10 = vrot.slane %v4907_v0, 3  ;;  %v693_v11 = vrot.slane %v691_v1, 4  ;;  %v4866_v13 = vshrl.u32 %v3785_v2, 16  ;;  %v3807_v14 = vld [vmem:[#allocation2 + $0x64] sm:$0xf]  ;;  %v4868_v18 = vshll.u32 %v3785_v2, 16 }
  0x5b   : > { %v686_v15 = vor.u32 %v685_v6, %v682_v5  ;;  %v735_v16 = vrot.slane %v4869_v7, 3  ;;  %v738_v17 = vrot.slane %v4875_v8, 4  ;;  %v2850_v19 = vld [vmem:[%s4853_s3 + $0xc] sm:$0x3]  ;;  %v699_v22 = vrot.slane %v4872_v4, 3  ;;  %s2955_s29 = sshll.u32 %s3541_s22, 5 }
  0x5c   : > { %v694_v20 = vor.u32 %v693_v11, %v690_v10  ;;  %v744_v21 = vrot.slane %v4866_v13, 3  ;;  %v4882_v23 = vshll.u32 %v3763_v55, 16  ;;  %3340 = vmatprep.subr.msk.bf16.mxu0 %vm832_vm1, %v2850_v19  ;;  %v3823_v24 = vld [vmem:[#allocation2 + $0x38] sm:$0xf]  ;;  %v747_v26 = vrot.slane %v4868_v18, 4  ;;  %s2614_s21 = sadd.s32 %s2983_s28, %s2955_s29  ;;  %s2617_s7 = sshll.u32 %s3696_s23, 4  ;;  %s4791_s7 = int_to_ptr.vmem [resolvable:$true] %s2617_s7 }
  0x5d   : > { %v3825_v25 = vor.u32 %v738_v17, %v735_v16  ;;  %v3831_v27 = vcombine.low %v3798_v9, %v3807_v14  ;;  %v1129_v28 = vsel %vm832_vm1, %v612_v3, 0  ;;  %v3834_v29 = vld [vmem:[#allocation2 + $0x3c] sm:$0xf]  ;;  %v3836_v30 = vld [vmem:[#allocation2 + $0x68] sm:$0xf]  ;;  %v1313_v33 = vsel %vm832_vm1, %v2850_v19, 0 }
  0x5e   : > { %v695_v31 = vsel %vm678_vm3, %v686_v15, %v694_v20  ;;  %v702_v32 = vrot.slane %v4882_v23, 4  ;;  %v3844_v34 = vcombine.low %v3823_v24, %v3834_v29  ;;  %v3846_v35 = vld [vmem:[#allocation2 + $0x6c] sm:$0xf]  ;;  %v3848_v36 = vld [vmem:[#allocation2 + $0x40] sm:$0xf]  ;;  %v748_v37 = vor.u32 %v747_v26, %v744_v21  ;;  %s2956_s22 = sshll.u32 %s2614_s21, 7 }
  0x5f   : > { %3103 = vmatprep.mubr.msk.bf16.mxu0 %vm795_vm2, %v695_v31  ;;  %v4864_v38 = vshrl.u32 %v3831_v27, 16  ;;  %v4867_v39 = vshll.u32 %v3831_v27, 16  ;;  %v3855_v40 = vcombine.low %v3836_v30, %v3846_v35  ;;  %v3857_v41 = vld [vmem:[#allocation2 + $0x44] sm:$0xf]  ;;  %v3859_v42 = vld [vmem:[#allocation2 + $0x70] sm:$0xf]  ;;  %s4789_s27 = scalar_lea.hbm %s4855_s5, %s2956_s22 }
  0x60   : > { %v703_v43 = vor.u32 %v702_v32, %v699_v22  ;;  %v4871_v44 = vshrl.u32 %v3844_v34, 16  ;;  %v4881_v45 = vshll.u32 %v3844_v34, 16  ;;  %v3865_v47 = vcombine.low %v3848_v36, %v3857_v41  ;;  %v3867_v48 = vld [vmem:[#allocation2 + $0x74] sm:$0xf]  ;;  %v3869_v49 = vld [vmem:[#allocation2 + $0x48] sm:$0xf] }
  0x61   : > { %v749_v50 = vsel %vm678_vm3, %v3825_v25, %v748_v37  ;;  %v753_v51 = vrot.slane %v4864_v38, 3  ;;  %v756_v3 = vrot.slane %v4867_v39, 4  ;;  %v4863_v5 = vshrl.u32 %v3855_v40, 16  ;;  %v3878_v6 = vld [vmem:[#allocation2 + $0x4c] sm:$0xf]  ;;  %s4988_s8 = sand.u32 1, %s3529_s19  }
  0x62   : > { %3115 = vmatprep.mubr.msk.bf16.mxu1 %vm795_vm2, %v749_v50  ;;  %v704_v10 = vsel %vm678_vm3, %v694_v20, %v703_v43  ;;  %v708_v11 = vrot.slane %v4871_v44, 3  ;;  %v711_v15 = vrot.slane %v4881_v45, 4  ;;  %v4865_v16 = vshll.u32 %v3855_v40, 16  ;;  %v3887_v17 = vld [vmem:[#allocation2 + $0x78] sm:$0xf]  ;;  %s4798_s10 = scalar_lea.sflag [#allocation4], %s4988_s8 }
  0x63   : > { %3104 = vmatmul.mubr.msk.bf16.vlgmr.msra.gmra.mrb[0].mxu0 %vm795_vm2, %v704_v10  ;;  %v757_v19 = vor.u32 %v756_v3, %v753_v51  ;;  %v762_v21 = vrot.slane %v4863_v5, 3  ;;  %v4870_v22 = vshrl.u32 %v3865_v47, 16  ;;  %v4876_v20 = vshll.u32 %v3865_v47, 16  ;;  %v3894_v26 = vld [vmem:[#allocation2 + $0x7c] sm:$0xf]  ;;  %s3459_s15 = scalar_lea.vmem %s4791_s7, 2048 }
  0x64   : > { %3154 = vmatpush3.bf16.msra.mxu0 %v1313_v33  ;;  %v712_v31 = vor.u32 %v711_v15, %v708_v11  ;;  %v765_v32 = vrot.slane %v4865_v16, 4  ;;  %v3900_v50 = vcombine.low %v3859_v42, %v3867_v48  ;;  %v3904_v51 = vcombine.low %v3869_v49, %v3878_v6  ;;  %v3915_v15 = vld [vmem:[#allocation2 + $0x80] sm:$0xf]  ;;  %v580_v5 = vld [vmem:[#allocation2 + $0x14] sm:$0xf]  ;;  %p3460_p10 = scmp.ne.s32.totalorder %s4791_s7, %s3459_s15  ;;  %s3558_s17 = smov [#allocation3]  }
  0x65   : > { %v758_v3 = vsel %vm678_vm3, %v748_v37, %v757_v19  ;;  %v717_v10 = vrot.slane %v4870_v22, 3  ;;  %v720_v33 = vrot.slane %v4876_v20, 4  ;;  %v3913_v11 = vcombine.low %v3887_v17, %v3894_v26  ;;  %v3924_v39 = vld [vmem:[%s4853_s3 + $0x2] sm:$0x3]  ;;  %v3929_v18 = vld [vmem:[%s4853_s3 + $0x8] sm:$0x3] }
  0x66   : > { %3116 = vmatmul.mubr.msk.bf16.vlgmr.msra.gmra.mrb[0].mxu1 %vm795_vm2, %v758_v3  ;;  %v713_v38 = vsel %vm678_vm3, %v703_v43, %v712_v31  ;;  %v766_v16 = vor.u32 %v765_v32, %v762_v21  ;;  %v4873_v37 = vshrl.u32 %v3900_v50, 16  ;;  %v4874_v13 = vshll.u32 %v3900_v50, 16  ;;  %v3935_v7 = vld [vmem:[#allocation2 + $0x18] sm:$0xf]  ;;  %3342 = vmatprep.subr.msk.bf16.mxu0 %vm832_vm1, %v3929_v18  ;;  %p3461_p11 = pnand %p3460_p10, %p3642_p3  ;;  %s3463_s13 = sshll.u32 %s3558_s17, 4  ;;  %s3464_s13 = int_to_ptr.vmem [resolvable:$false] %s3463_s13 }
  0x67   : > { %3128 = vmatpush3.bf16.msra.mxu1 %v1129_v28  ;;  %3107 = vmatprep.mubr.msk.bf16.mxu0 %vm795_vm2, %v713_v38  ;;  %v721_v3 = vor.u32 %v720_v33, %v717_v10  ;;  %v4877_v43 = vshrl.u32 %v3904_v51, 16  ;;  %v4878_v21 = vshll.u32 %v3904_v51, 16  ;;  %v4879_v32 = vshrl.u32 %v3913_v11, 16  ;;  %v3943_v38 = vld [vmem:[#allocation2 + $0x1c] sm:$0xf]  ;;  %s3465_s16 = scalar_lea.vmem %s3464_s13, 4096  ;;  %p3466_p13 = scmp.lt.s32.totalorder %s4791_s7, %s3464_s13 }
  0x68   : > { %v767_v22 = vsel %vm678_vm3, %v757_v19, %v766_v16  ;;  %v771_v44 = vrot.slane %v4873_v37, 3  ;;  %v774_v4 = vrot.slane %v4874_v13, 4  ;;  %v4880_v28 = vshll.u32 %v3913_v11, 16  ;;  %3341 = vmatprep.subr.msk.bf16.mxu1 %vm832_vm1, %v3924_v39  ;;  %p3462_p12 = pneg %p3461_p11  ;;  %p3467_p0 = scmp.lt.s32.totalorder %s3465_s16, %s3459_s15 }
  0x69   : > { %3119 = vmatprep.mubr.msk.bf16.mxu1 %vm795_vm2, %v767_v22  ;;  %v722_v19 = vsel %vm678_vm3, %v712_v31, %v721_v3  ;;  %v726_v10 = vrot.slane %v4877_v43, 3  ;;  %v729_v33 = vrot.slane %v4878_v21, 4  ;;  %v780_v37 = vrot.slane %v4879_v32, 3 }
  0x6a   : > { %v775_v13 = vor.u32 %v774_v4, %v771_v44  ;;  %v783_v8 = vrot.slane %v4880_v28, 4  ;;  %v2812_v20 = vcombine.low %v3915_v15, %v3915_v15  ;;  %v2825_v22 = vcombine.low %v580_v5, %v3935_v7  ;;  %p3468_p1 = por %p3467_p0, %p3466_p13 }
  0x6b   : > { %3108 = vmatmul.mubr.msk.bf16.gmra.mrb[4].mxu0 %vm795_vm2, %v722_v19  ;;  %v730_v31 = vor.u32 %v729_v33, %v726_v10  ;;  %v2826_v43 = vcombine.low %v3943_v38, %v3750_v46  ;;  %v3967_v21 = vcombine.low %v3755_v52, %v3823_v24  ;;  %v4893_v4 = vshrl.u32 %v3804_v12, 16 }
  0x6c   : > { %v776_v44 = vsel %vm678_vm3, %v766_v16, %v775_v13  ;;  %v784_v32 = vor.u32 %v783_v8, %v780_v37  ;;  %v787_v28 = vshrl.u32 %v2812_v20, 16  ;;  %v790_v45 = vshll.u32 %v2812_v20, 16  ;;  %p3469_p2 = pnand %p3468_p1, %p3462_p12 }
  0x6d   : > { %v731_v23 = vsel %vm678_vm3, %v721_v3, %v730_v31  ;;  %v740_v5 = vsel %vm678_vm3, %v730_v31, %v3825_v25  ;;  %v977_v19 = vshrl.u32 %v2825_v22, 16  ;;  %v980_v10 = vshll.u32 %v2825_v22, 16 }
  0x6e   : > { %3120 = vmatmul.mubr.msk.bf16.gmra.mrb[4].mxu1 %vm795_vm2, %v776_v44  ;;  %3111 = vmatprep.mubr.msk.bf16.mxu0 %vm795_vm2, %v731_v23  ;;  %v785_v46 = vsel %vm678_vm3, %v775_v13, %v784_v32  ;;  %v789_v52 = vrot.slane %v787_v28, 3  ;;  %v792_v24 = vrot.slane %v790_v45, 4  ;;  %v985_v33 = vshrl.u32 %v2826_v43, 16 }
  0x6f   : > { %3123 = vmatprep.mubr.msk.bf16.mxu1 %vm795_vm2, %v785_v46  ;;  %v979_v8 = vrot.slane %v977_v19, 3  ;;  %v982_v16 = vrot.slane %v980_v10, 4  ;;  %v988_v20 = vshll.u32 %v2826_v43, 16  ;;  %v1005_v37 = vrot.slane %v4893_v4, 3  ;;  %v4126_v4 = vld [vmem:[#allocation2 + $0x8c] sm:$0xf] }
  0x70   : > { %v793_v25 = vor.u32 %v792_v24, %v789_v52  ;;  %v987_v3 = vrot.slane %v985_v33, 3  ;;  %v4901_v22 = vshll.u32 %v3804_v12, 16  ;;  %v4890_v31 = vshrl.u32 %v3967_v21, 16 }
  0x71   : > { %v983_v23 = vor.u32 %v982_v16, %v979_v8  ;;  %v990_v44 = vrot.slane %v988_v20, 4  ;;  %v4900_v13 = vshll.u32 %v3967_v21, 16  ;;  %v4899_v45 = vshrl.u32 %v3771_v60, 16 }
  0x72   : > { %v794_v28 = vsel %vm678_vm3, %v784_v32, %v793_v25  ;;  %v1008_v43 = vrot.slane %v4901_v22, 4  ;;  %v1014_v19 = vrot.slane %v4890_v31, 3  ;;  %v4906_v10 = vshll.u32 %v3771_v60, 16 }
  0x73   : > { %3112 = vmatmul.mubr.msk.bf16.gmra.mrb[8].mxu0 %vm795_vm2, %v740_v5  ;;  %v991_v46 = vor.u32 %v990_v44, %v987_v3  ;;  %v1017_v52 = vrot.slane %v4900_v13, 4  ;;  %v996_v24 = vrot.slane %v4899_v45, 3  ;;  %v3997_v32 = vcombine.low %v3834_v29, %v3848_v36 }
  0x74   : > { %v1009_v33 = vor.u32 %v1008_v43, %v1005_v37  ;;  %v999_v8 = vrot.slane %v4906_v10, 4  ;;  %v1481_v16 = vsel %vm832_vm1, %v3924_v39, 0  ;;  %v4009_v29 = vcombine.low %v3857_v41, %v3869_v49 }
  0x75   : > { %v992_v5 = vsel %vm678_vm3, %v983_v23, %v991_v46  ;;  %v1018_v20 = vor.u32 %v1017_v52, %v1014_v19  ;;  %v4886_v25 = vshrl.u32 %v3997_v32, 16  ;;  %v4898_v3 = vshll.u32 %v3997_v32, 16 }
  0x76   : > { %3124 = vmatmul.mubr.msk.bf16.gmra.mrb[8].mxu1 %vm795_vm2, %v794_v28  ;;  %v1000_v44 = vor.u32 %v999_v8, %v996_v24  ;;  %v4013_v36 = vcombine.low %v3878_v6, %v3765_v56  ;;  %v4017_v39 = vcombine.low %v3767_v57, %v3773_v61  ;;  %v1647_v49 = vsel %vm832_vm1, %v3929_v18, 0 }
  0x77   : > { %3129 = vmatprep.mubr.msk.bf16.mxu1 %vm795_vm2, %v992_v5  ;;  %v4021_v37 = vsel %vm678_vm3, %v1009_v33, %v1018_v20  ;;  %v1023_v23 = vrot.slane %v4886_v25, 3  ;;  %v1026_v41 = vrot.slane %v4898_v3, 4  ;;  %v4884_v57 = vshrl.u32 %v4009_v29, 16 }
  0x78   : > { %3155 = vmatprep.mubr.msk.bf16.mxu0 %vm795_vm2, %v4021_v37  ;;  %v1001_v56 = vsel %vm678_vm3, %v991_v46, %v1000_v44  ;;  %v4889_v61 = vshll.u32 %v4009_v29, 16  ;;  %v4036_v6 = vcombine.low %v3775_v62, %v3798_v9  ;;  %v4883_v43 = vshrl.u32 %v4013_v36, 16 }
  0x79   : > { %v1027_v28 = vor.u32 %v1026_v41, %v1023_v23  ;;  %v4888_v19 = vshll.u32 %v4013_v36, 16  ;;  %v4885_v18 = vshrl.u32 %v4017_v39, 16  ;;  %v1010_v52 = vsel %vm678_vm3, %v1000_v44, %v1009_v33  ;;  %v4057_v33 = vld [vmem:[%s4853_s3 + $0x4] sm:$0x3] }
  0x7a   : > { %v1032_v46 = vrot.slane %v4884_v57, 3  ;;  %v1035_v24 = vrot.slane %v4889_v61, 4  ;;  %v4887_v8 = vshll.u32 %v4017_v39, 16  ;;  %v1041_v9 = vrot.slane %v4883_v43, 3 }
  0x7b   : > { %v1028_v62 = vsel %vm678_vm3, %v1018_v20, %v1027_v28  ;;  %v1044_v5 = vrot.slane %v4888_v19, 4  ;;  %v1050_v23 = vrot.slane %v4885_v18, 3  ;;  %v4891_v41 = vshrl.u32 %v4036_v6, 16 }
  0x7c   : > { %3156 = vmatmul.mubr.msk.bf16.vlgmr.msra.gmra.mrb[12].mxu0 %vm795_vm2, %v1028_v62  ;;  %v1036_v44 = vor.u32 %v1035_v24, %v1032_v46  ;;  %v1053_v20 = vrot.slane %v4887_v8, 4  ;;  %v4892_v43 = vshll.u32 %v4036_v6, 16  ;;  %v4066_v18 = vcombine.low %v3807_v14, %v3836_v30  ;;  %v4079_v24 = vld [vmem:[%s4853_s3 + $0xe] sm:$0x3] }
  0x7d   : > { %3206 = vmatpush3.bf16.msra.mxu0 %v1647_v49  ;;  %v1045_v57 = vor.u32 %v1044_v5, %v1041_v9  ;;  %v4070_v25 = vcombine.low %v3846_v35, %v3859_v42  ;;  %v4074_v46 = vcombine.low %v3867_v48, %v3887_v17  ;;  %v4087_v30 = vcombine.low %v3894_v26, %v3915_v15  ;;  %v4099_v9 = vld [vmem:[#allocation2 + $0x84] sm:$0xf]  ;;  %v4101_v5 = vld [vmem:[#allocation2 + $0x88] sm:$0xf] }
  0x7e   : > { %3130 = vmatmul.mubr.msk.bf16.vlgmr.msra.gmra.mrb[12].mxu1 %vm795_vm2, %v1001_v56  ;;  %v4083_v49 = vsel %vm678_vm3, %v1027_v28, %v1036_v44  ;;  %v1054_v14 = vor.u32 %v1053_v20, %v1050_v23  ;;  %3344 = vmatprep.subr.msk.bf16.mxu0 %vm832_vm1, %v4057_v33  ;;  %v4894_v35 = vshrl.u32 %v4066_v18, 16  ;;  %v4895_v42 = vshll.u32 %v4066_v18, 16 }
  0x7f   : > { %3180 = vmatpush3.bf16.msra.mxu1 %v1481_v16  ;;  %3133 = vmatprep.mubr.msk.bf16.mxu1 %vm795_vm2, %v1010_v52  ;;  %v4896_v56 = vshrl.u32 %v4070_v25, 16  ;;  %v4897_v28 = vshll.u32 %v4070_v25, 16  ;;  %v4902_v26 = vshrl.u32 %v4074_v46, 16  ;;  %v1046_v16 = vsel %vm678_vm3, %v1036_v44, %v1045_v57 }
  0x80   : > { %3159 = vmatprep.mubr.msk.bf16.mxu0 %vm795_vm2, %v4083_v49  ;;  %3343 = vmatprep.subr.msk.bf16.mxu1 %vm832_vm1, %v4079_v24  ;;  %v1059_v52 = vrot.slane %v4891_v41, 3  ;;  %v1062_v23 = vrot.slane %v4892_v43, 4  ;;  %v4903_v20 = vshll.u32 %v4074_v46, 16  ;;  %v4112_v8 = vsel %vm678_vm3, %v1045_v57, %v1054_v14 }
  0x81   : > { %v1068_v19 = vrot.slane %v4894_v35, 3  ;;  %v1071_v61 = vrot.slane %v4895_v42, 4  ;;  %v4904_v31 = vshrl.u32 %v4087_v30, 16  ;;  %v1077_v44 = vrot.slane %v4896_v56, 3 }
  0x82   : > { %v1080_v41 = vrot.slane %v4897_v28, 4  ;;  %v4905_v43 = vshll.u32 %v4087_v30, 16  ;;  %v2853_v57 = vcombine.low %v4099_v9, %v4101_v5  ;;  %v1267_v35 = vrot.slane %v4902_v26, 3 }
  0x83   : > { %v1270_v42 = vrot.slane %v4903_v20, 4  ;;  %v1063_v56 = vor.u32 %v1062_v23, %v1059_v52  ;;  %v1276_v28 = vrot.slane %v4904_v31, 3  ;;  %v1072_v13 = vor.u32 %v1071_v61, %v1068_v19 }
  0x84   : > { %3160 = vmatmul.mubr.msk.bf16.gmra.mrb[16].mxu0 %vm795_vm2, %v1046_v16  ;;  %v1279_v3 = vrot.slane %v4905_v43, 4  ;;  %v1283_v45 = vshrl.u32 %v2853_v57, 16  ;;  %v1286_v22 = vshll.u32 %v2853_v57, 16  ;;  %v2854_v26 = vcombine.low %v4126_v4, %v4126_v4 }
  0x85   : > { %3163 = vmatprep.mubr.msk.bf16.mxu0 %vm795_vm2, %v4112_v8  ;;  %v4144_v20 = vor.u32 %v1080_v41, %v1077_v44  ;;  %v1271_v52 = vor.u32 %v1270_v42, %v1267_v35  ;;  %v4148_v23 = vcombine.low %v3867_v48, %v3867_v48  ;;  %v1064_v31 = vsel %vm678_vm3, %v1054_v14, %v1063_v56 }
  0x86   : > { %3134 = vmatmul.mubr.msk.bf16.gmra.mrb[16].mxu1 %vm795_vm2, %v4021_v37  ;;  %v1280_v43 = vor.u32 %v1279_v3, %v1276_v28  ;;  %v1285_v10 = vrot.slane %v1283_v45, 3  ;;  %v1288_v0 = vrot.slane %v1286_v22, 4  ;;  %v4152_v37 = vsel %vm678_vm3, %v1063_v56, %v1072_v13 }
  0x87   : > { %3137 = vmatprep.mubr.msk.bf16.mxu1 %vm795_vm2, %v1028_v62  ;;  %v1292_v61 = vshrl.u32 %v2854_v26, 16  ;;  %v1951_v19 = vrot.slane %v691_v1, 1  ;;  %v4158_v62 = vsel %vm678_vm3, %v1072_v13, %v4144_v20  ;;  %v1295_v41 = vshll.u32 %v2854_v26, 16 }
  0x88   : > { %v4162_v48 = vrot.slane %v683_v59, 1  ;;  %v1272_v22 = vsel %vm678_vm3, %v4144_v20, %v1271_v52  ;;  %vm1941_vm4 = vsmask.f32 7424  ;;  %v4172_v1 = vsel %vm678_vm3, %v1271_v52, %v1280_v43 }
  0x89   : > { %v4174_v13 = vor.u32 %v1288_v0, %v1285_v10  ;;  %v4924_v14 = vshrl.u32 %v3760_v54, 16  ;;  %v4183_v42 = vrot.slane %v1292_v61, 3  ;;  %v4925_v56 = vshll.u32 %v3763_v55, 16 }
  0x8a   : > { %4923 = vst [vmem:[#allocation13_spill] sm:$0xff] %v4162_v48  ;;  %v1950_v59 = vor.u32 %v4162_v48, %v680_v58  ;;  %v4926_v26 = vshll.u32 %v3844_v34, 16  ;;  %v4927_v0 = vshll.u32 %v3865_v47, 16  ;;  %v4192_v58 = vrot.slane %v1295_v41, 4 }
  0x8b   : > { %v1953_v35 = vor.u32 %v1951_v19, %v4924_v14  ;;  %v1954_v28 = vrot.slane %v4925_v56, 1  ;;  %v4930_v61 = vshll.u32 %v3779_v63, 16  ;;  %v4934_v41 = vshrl.u32 %v3865_v47, 16 }
  0x8c   : > { %3164 = vmatmul.mubr.msk.bf16.gmra.mrb[20].mxu0 %vm795_vm2, %v1064_v31  ;;  %v1957_v44 = vrot.slane %v4926_v26, 1  ;;  %v1960_v10 = vrot.slane %v4927_v0, 1  ;;  %v4195_v57 = vsel %vm1941_vm4, %v1950_v59, %v1951_v19  ;;  %v4932_v26 = vshrl.u32 %v3763_v55, 16 }
  0x8d   : > { %3167 = vmatprep.mubr.msk.bf16.mxu0 %vm795_vm2, %v4152_v37  ;;  %4928 = vst [vmem:[#allocation14_spill] sm:$0xff] %v4195_v57  ;;  %v1966_v14 = vrot.slane %v4930_v61, 1  ;;  %v4202_v56 = vsel %vm1941_vm4, %v1953_v35, %v1954_v28  ;;  %v4933_v0 = vshrl.u32 %v3844_v34, 16  ;;  %v1290_v19 = vsel %vm678_vm3, %v1280_v43, %v4174_v13 }
  0x8e   : > { %3138 = vmatmul.mubr.msk.bf16.gmra.mrb[20].mxu1 %vm795_vm2, %v4083_v49  ;;  %v4929_v49 = vshll.u32 %v3904_v51, 16  ;;  %4931 = vst [vmem:[#allocation15_spill] sm:$0xff] %v4202_v56  ;;  %v1956_v3 = vor.u32 %v1954_v28, %v4932_v26  ;;  %v1962_v45 = vor.u32 %v1960_v10, %v4934_v41  ;;  %v4935_v59 = vshrl.u32 %v3904_v51, 16 }
  0x8f   : > { %3141 = vmatprep.mubr.msk.bf16.mxu1 %vm795_vm2, %v1046_v16  ;;  %v1959_v16 = vor.u32 %v1957_v44, %v4933_v0  ;;  %v4936_v61 = vshrl.u32 %v3779_v63, 16  ;;  %v4937_v35 = vshll.u32 %v3785_v2, 16  ;;  %v4938_v43 = vshll.u32 %v3831_v27, 16 }
  0x90   : > { %v1963_v52 = vrot.slane %v4929_v49, 1  ;;  %v4219_v28 = vsel %vm1941_vm4, %v1956_v3, %v1957_v44  ;;  %v4942_v3 = vshll.u32 %v3855_v40, 16 }
  0x91   : > { %v1968_v57 = vor.u32 %v1966_v14, %v4936_v61  ;;  %v1969_v56 = vrot.slane %v4937_v35, 1  ;;  %v4222_v26 = vsel %vm1941_vm4, %v1959_v16, %v1960_v10  ;;  %v1972_v41 = vrot.slane %v4938_v43, 1 }
  0x92   : > { %v1965_v49 = vor.u32 %v1963_v52, %v4935_v59  ;;  %v4225_v0 = vsel %vm1941_vm4, %v1962_v45, %v1963_v52  ;;  %v4941_v35 = vshrl.u32 %v3785_v2, 16  ;;  %v1975_v44 = vrot.slane %v4942_v3, 1 }
  0x93   : > { %v4233_v61 = vsel %vm1941_vm4, %v1968_v57, %v1969_v56  ;;  %v4943_v45 = vshrl.u32 %v3831_v27, 16  ;;  %v4245_v52 = vcombine.low %v3915_v15, %v4099_v9  ;;  %v4251_v16 = vcombine.low %v4101_v5, %v4126_v4 }
  0x94   : > { %v4230_v59 = vsel %vm1941_vm4, %v1965_v49, %v1966_v14  ;;  %4940 = vst [vmem:[#allocation17_spill] sm:$0xff] %v4233_v61  ;;  %v1971_v48 = vor.u32 %v1969_v56, %v4941_v35  ;;  %3168 = vmatmul.mubr.msk.bf16.gmra.mrb[24].mxu0 %vm795_vm2, %v4158_v62  ;;  %v4944_v14 = vshll.u32 %v3900_v50, 16  ;;  %v4946_v49 = vshrl.u32 %v3855_v40, 16 }
  0x95   : > { %4939 = vst [vmem:[#allocation16_spill] sm:$0xff] %v4230_v59  ;;  %v1974_v10 = vor.u32 %v1972_v41, %v4943_v45  ;;  %3171 = vmatprep.mubr.msk.bf16.mxu0 %vm795_vm2, %v1272_v22  ;;  %v2910_v35 = vcombine.low %v3887_v17, %v3887_v17  ;;  %v4947_v15 = vshll.u32 %v3771_v60, 16  ;;  %v4949_v5 = vshrl.u32 %v3900_v50, 16 }
  0x96   : > { %v1978_v57 = vrot.slane %v4944_v14, 1  ;;  %v4255_v56 = vsel %vm1941_vm4, %v1971_v48, %v1972_v41  ;;  %v1977_v43 = vor.u32 %v1975_v44, %v4946_v49  ;;  %3142 = vmatmul.mubr.msk.bf16.gmra.mrb[24].mxu1 %vm795_vm2, %v4112_v8  ;;  %v4950_v48 = vshll.u32 %v3804_v12, 16 }
  0x97   : > { %4945 = vst [vmem:[#allocation18_spill] sm:$0xff] %v4255_v56  ;;  %v2165_v3 = vrot.slane %v4947_v15, 1  ;;  %v4266_v4 = vsel %vm1941_vm4, %v1974_v10, %v1975_v44  ;;  %v4951_v45 = vshll.u32 %v3967_v21, 16  ;;  %3145 = vmatprep.mubr.msk.bf16.mxu1 %vm795_vm2, %v1064_v31  ;;  %v1982_v49 = vshll.u32 %v2910_v35, 16 }
  0x98   : > { %4948 = vst [vmem:[#allocation19_spill] sm:$0xff] %v4266_v4  ;;  %v1980_v22 = vor.u32 %v1978_v57, %v4949_v5  ;;  %v2167_v41 = vrot.slane %v4950_v48, 1  ;;  %v4276_v17 = vsel %vm1941_vm4, %v1977_v43, %v1978_v57  ;;  %v4953_v8 = vshrl.u32 %v3771_v60, 16 }
  0x99   : > { %v2170_v14 = vrot.slane %v4951_v45, 1  ;;  %4952 = vst [vmem:[#allocation20_spill] sm:$0xff] %v4276_v17  ;;  %v4954_v44 = vshll.u32 %v3997_v32, 16  ;;  %v4955_v5 = vshrl.u32 %v3804_v12, 16  ;;  %v4956_v48 = vshrl.u32 %v3967_v21, 16 }
  0x9a   : > { %v2166_v15 = vor.u32 %v2165_v3, %v4953_v8  ;;  %v4957_v45 = vshll.u32 %v4009_v29, 16  ;;  %v4958_v31 = vshll.u32 %v4013_v36, 16  ;;  %v1984_v43 = vrot.slane %v1982_v49, 1 }
  0x9b   : > { %v2173_v10 = vrot.slane %v4954_v44, 1  ;;  %v2169_v4 = vor.u32 %v2167_v41, %v4955_v5  ;;  %v2172_v56 = vor.u32 %v2170_v14, %v4956_v48  ;;  %v4960_v3 = vshrl.u32 %v3997_v32, 16 }
  0x9c   : > { %v2176_v61 = vrot.slane %v4957_v45, 1  ;;  %v2179_v57 = vrot.slane %v4958_v31, 1  ;;  %v4291_v35 = vsel %vm1941_vm4, %v2166_v15, %v2167_v41  ;;  %v4961_v44 = vshll.u32 %v4017_v39, 16  ;;  %3172 = vmatmul.mubr.msk.bf16.gmra.mrb[28].mxu0 %vm795_vm2, %v4172_v1 }
  0x9d   : > { %4959 = vst [vmem:[#allocation21_spill] sm:$0xff] %v4291_v35  ;;  %v2175_v8 = vor.u32 %v2173_v10, %v4960_v3  ;;  %v4298_v5 = vsel %vm1941_vm4, %v2169_v4, %v2170_v14  ;;  %v4301_v48 = vsel %vm1941_vm4, %v2172_v56, %v2173_v10  ;;  %v4962_v45 = vshrl.u32 %v4009_v29, 16  ;;  %3175 = vmatprep.mubr.msk.bf16.mxu0 %vm795_vm2, %v1290_v19 }
  0x9e   : > { %v2182_v17 = vrot.slane %v4961_v44, 1  ;;  %v4963_v49 = vshrl.u32 %v4013_v36, 16  ;;  %v4964_v41 = vshrl.u32 %v4148_v23, 16  ;;  %v4965_v3 = vshll.u32 %v4148_v23, 16  ;;  %3146 = vmatmul.mubr.msk.bf16.gmra.mrb[28].mxu1 %vm795_vm2, %v4152_v37 }
  0x9f   : > { %v2178_v59 = vor.u32 %v2176_v61, %v4962_v45  ;;  %v4312_v44 = vsel %vm1941_vm4, %v1980_v22, %v1984_v43  ;;  %v4315_v4 = vsel %vm1941_vm4, %v2175_v8, %v2176_v61  ;;  %v1298_v23 = vor.u32 %v4192_v58, %v4183_v42  ;;  %3149 = vmatprep.mubr.msk.bf16.mxu1 %vm795_vm2, %v4158_v62 }
  0xa0   : > { %v2181_v31 = vor.u32 %v2179_v57, %v4963_v49  ;;  %v1086_v15 = vrot.slane %v4964_v41, 3  ;;  %v1089_v35 = vrot.slane %v4965_v3, 4  ;;  %v4966_v61 = vshrl.u32 %v4017_v39, 16 }
  0xa1   : > { %v4320_v56 = vsel %vm1941_vm4, %v2178_v59, %v2179_v57  ;;  %v4967_v43 = vshll.u32 %v4036_v6, 16  ;;  %v4968_v57 = vshll.u32 %v4066_v18, 16  ;;  %v4969_v42 = vshrl.u32 %v4036_v6, 16 }
  0xa2   : > { %v4323_v14 = vsel %vm1941_vm4, %v2181_v31, %v2182_v17  ;;  %v2184_v10 = vor.u32 %v2182_v17, %v4966_v61  ;;  %v1090_v59 = vor.u32 %v1089_v35, %v1086_v15  ;;  %v1299_v37 = vsel %vm678_vm3, %v4174_v13, %v1298_v23 }
  0xa3   : > { %v2185_v1 = vrot.slane %v4967_v43, 1  ;;  %v2188_v8 = vrot.slane %v4968_v57, 1  ;;  %v4352_v62 = vcombine.low %v3935_v7, %v3943_v38  ;;  %v4970_v35 = vshrl.u32 %v4066_v18, 16 }
  0xa4   : > { %v1091_v45 = vsel %vm678_vm3, %v4144_v20, %v1090_v59  ;;  %3176 = vmatmul.mubr.msk.bf16.gmra.mrb[32].mxu0 %vm795_vm2, %v1299_v37  ;;  %v4971_v49 = vshll.u32 %v4070_v25, 16  ;;  %v4972_v20 = vshll.u32 %v3913_v11, 16  ;;  %v4973_v38 = vshll.u32 %v4074_v46, 16 }
  0xa5   : > { %v4339_v19 = vsel %vm1941_vm4, %v2184_v10, %v2185_v1  ;;  %v2187_v58 = vor.u32 %v2185_v1, %v4969_v42  ;;  %3207 = vmatprep.mubr.msk.bf16.mxu0 %vm795_vm2, %v3771_v60  ;;  %v2190_v13 = vor.u32 %v2188_v8, %v4970_v35  ;;  %v4974_v60 = vshrl.u32 %v4070_v25, 16  ;;  %v2937_v1 = vld [vmem:[%s4853_s3 + $0x10] sm:$0x3] }
  0xa6   : > { %3150 = vmatmul.mubr.msk.bf16.gmra.mrb[32].mxu1 %vm795_vm2, %v1091_v45  ;;  %v2191_v31 = vrot.slane %v4971_v49, 1  ;;  %v2386_v7 = vrot.slane %v4972_v20, 1  ;;  %v2194_v41 = vrot.slane %v4973_v38, 1  ;;  %v2389_v61 = vshll.u32 %v4245_v52, 16 }
  0xa7   : > { %v4346_v17 = vsel %vm1941_vm4, %v2187_v58, %v2188_v8  ;;  %3181 = vmatprep.mubr.msk.bf16.mxu1 %vm795_vm2, %v4352_v62  ;;  %v2023_v10 = vsel %vm832_vm1, %v4057_v33, 0  ;;  %v4975_v59 = vshrl.u32 %v3913_v11, 16  ;;  %v2923_v33 = vld [vmem:[%s4853_s3 + $0xa] sm:$0x3]  ;;  %v2396_v45 = vshll.u32 %v4251_v16, 16 }
  0xa8   : > { %v4369_v15 = vsel %vm1941_vm4, %v2190_v13, %v2191_v31  ;;  %v2193_v3 = vor.u32 %v2191_v31, %v4974_v60  ;;  %v4374_v23 = vsel %vm1941_vm4, %v1980_v22, %v2386_v7  ;;  %v2391_v8 = vrot.slane %v2389_v61, 1 }
  0xa9   : > { %v2388_v57 = vor.u32 %v2386_v7, %v4975_v59  ;;  %v1799_v22 = vsel %vm832_vm1, %v4079_v24, 0  ;;  %v4977_v24 = vshll.u32 %v4087_v30, 16  ;;  %v2924_v35 = vcombine.low %v4099_v9, %v4099_v9 }
  0xaa   : > { %v4380_v43 = vsel %vm1941_vm4, %v2193_v3, %v2194_v41  ;;  %v4978_v49 = vshrl.u32 %v4087_v30, 16  ;;  %v2398_v7 = vrot.slane %v2396_v45, 1 }
  0xab   : > { %v4397_v42 = vsel %vm1941_vm4, %v2388_v57, %v2391_v8  ;;  %v2197_v37 = vrot.slane %v4977_v24, 1  ;;  %v2201_v38 = vshll.u32 %v2924_v35, 16  ;;  %v4981_v57 = vld [vmem:[#allocation15_spill] sm:$0xff] }
  0xac   : > { %3208 = vmatmul.mubr.msk.bf16.vlgmr.msra.gmra.mrb[36].mxu0 %vm795_vm2, %v3804_v12  ;;  %v4976_v12 = vshrl.u32 %v4074_v46, 16 }
  0xad   : > { %3258 = vmatpush3.bf16.msra.mxu0 %v2023_v10  ;;  %3211 = vmatprep.mubr.msk.bf16.mxu0 %vm795_vm2, %v3967_v21  ;;  %v2393_v21 = vshrl.u32 %v4245_v52, 16  ;;  %v2199_v31 = vor.u32 %v2197_v37, %v4978_v49  ;;  %v2203_v3 = vrot.slane %v2201_v38, 1 }
  0xae   : > { %3182 = vmatmul.mubr.msk.bf16.vlgmr.msra.gmra.mrb[36].mxu1 %vm795_vm2, %v3758_v53  ;;  %3346 = vmatprep.subr.msk.bf16.mxu0 %vm832_vm1, %v2937_v1  ;;  %v2196_v58 = vor.u32 %v2194_v41, %v4976_v12  ;;  %v3458_v53 = vld [vmem:[#allocation2 + $0x90] ss:$0 sps:$4 sm:$0xff]  }
  0xaf   : > { %3232 = vmatpush3.bf16.msra.mxu1 %v1799_v22  ;;  %3185 = vmatprep.mubr.msk.bf16.mxu1 %vm795_vm2, %v3760_v54  ;;  %v2395_v20 = vor.u32 %v2393_v21, %v2391_v8  ;;  %v2400_v54 = vshrl.u32 %v4251_v16, 16  ;;  %v2404_v41 = vshll.u32 %v3458_v53, 16  ;;  %v4427_v10 = vsel %vm1941_vm4, %v2199_v31, %v2203_v3 }
  0xb0   : > { %3345 = vmatprep.subr.msk.bf16.mxu1 %vm832_vm1, %v2923_v33  ;;  %v4414_v13 = vsel %vm1941_vm4, %v2196_v58, %v2197_v37 }
  0xb1   : > { %v4420_v60 = vsel %vm1941_vm4, %v2395_v20, %v2398_v7  ;;  %v2402_v9 = vor.u32 %v2400_v54, %v2398_v7  ;;  %v2406_v61 = vrot.slane %v2404_v41, 1 }
  0xb3   : > { %v4432_v59 = vsel %vm1941_vm4, %v2402_v9, %v2406_v61 }
  0xb4   : > { %3212 = vmatmul.mubr.msk.bf16.gmra.mrb[40].mxu0 %vm795_vm2, %v3997_v32  ;;  %v1944_v32 = vshll.u32 %v4352_v62, 16 }
  0xb5   : > { %3215 = vmatprep.mubr.msk.bf16.mxu0 %vm795_vm2, %v4009_v29  ;;  %v1942_v29 = vshrl.u32 %v4352_v62, 16  ;;  %v2242_v62 = vsel %vm832_vm1, %v2923_v33, 0 }
  0xb6   : > { %3186 = vmatmul.mubr.msk.bf16.gmra.mrb[40].mxu1 %vm795_vm2, %v3763_v55 }
  0xb7   : > { %3189 = vmatprep.mubr.msk.bf16.mxu1 %vm795_vm2, %v3844_v34 }
  0xbc   : > { %3216 = vmatmul.mubr.msk.bf16.gmra.mrb[44].mxu0 %vm795_vm2, %v4013_v36  ;;  %v1946_v36 = vrot.slane %v1944_v32, 1 }
  0xbd   : > { %3219 = vmatprep.mubr.msk.bf16.mxu0 %vm795_vm2, %v4017_v39 }
  0xbe   : > { %3190 = vmatmul.mubr.msk.bf16.gmra.mrb[44].mxu1 %vm795_vm2, %v3865_v47  ;;  %v1947_v39 = vor.u32 %v1946_v36, %v1942_v29 }
  0xbf   : > { %3193 = vmatprep.mubr.msk.bf16.mxu1 %vm795_vm2, %v3904_v51 }
  0xc4   : > { %3220 = vmatmul.mubr.msk.bf16.gmra.mrb[48].mxu0 %vm795_vm2, %v4036_v6  ;;  %v4979_v6 = vld [vmem:[#allocation13_spill] sm:$0xff] }
  0xc5   : > { %3223 = vmatprep.mubr.msk.bf16.mxu0 %vm795_vm2, %v4066_v18  ;;  %v1949_v18 = vsel %vm1941_vm4, %v1947_v39, %v4979_v6 }
  0xc6   : > { %3194 = vmatmul.mubr.msk.bf16.gmra.mrb[48].mxu1 %vm795_vm2, %v3779_v63 }
  0xc7   : > { %3197 = vmatprep.mubr.msk.bf16.mxu1 %vm795_vm2, %v3785_v2 }
  0xcc   : > { %3224 = vmatmul.mubr.msk.bf16.gmra.mrb[52].mxu0 %vm795_vm2, %v4070_v25  ;;  %v2421_v25 = vsel %vm832_vm1, %v2937_v1, 0 }
  0xcd   : > { %3227 = vmatprep.mubr.msk.bf16.mxu0 %vm795_vm2, %v4074_v46  ;;  %v4980_v46 = vld [vmem:[#allocation14_spill] sm:$0xff] }
  0xce   : > { %3198 = vmatmul.mubr.msk.bf16.gmra.mrb[52].mxu1 %vm795_vm2, %v3831_v27 }
  0xcf   : > { %3201 = vmatprep.mubr.msk.bf16.mxu1 %vm795_vm2, %v3855_v40 }
  0xd4   : > { %3228 = vmatmul.mubr.msk.bf16.gmra.mrb[56].mxu0 %vm795_vm2, %v4087_v30 }
  0xd5   : > { %3259 = vmatprep.mubr.msk.bf16.mxu0 %vm795_vm2, %v1949_v18 }
  0xd6   : > { %3202 = vmatmul.mubr.msk.bf16.gmra.mrb[56].mxu1 %vm795_vm2, %v3900_v50 }
  0xd7   : > { %3233 = vmatprep.mubr.msk.bf16.mxu1 %vm795_vm2, %v3763_v55  ;;  %v4982_v55 = vld [vmem:[#allocation16_spill] sm:$0xff] }
  0xdc   : > { %3260 = vmatmul.mubr.msk.bf16.vlgmr.msra.gmra.mrb[60].mxu0 %vm795_vm2, %v4980_v46 }
  0xdd   : > { %3310 = vmatpush3.bf16.msra.mxu0 %v2421_v25  ;;  %3263 = vmatprep.mubr.msk.bf16.mxu0 %vm795_vm2, %v4981_v57 }
  0xde   : > { %3234 = vmatmul.mubr.msk.bf16.vlgmr.msra.gmra.mrb[60].mxu1 %vm795_vm2, %v3844_v34  ;;  %v4983_v34 = vld [vmem:[#allocation17_spill] sm:$0xff] }
  0xdf   : > { %3284 = vmatpush3.bf16.msra.mxu1 %v2242_v62  ;;  %3237 = vmatprep.mubr.msk.bf16.mxu1 %vm795_vm2, %v3865_v47  ;;  %v4984_v47 = vld [vmem:[#allocation18_spill] sm:$0xff] }
  0xe4   : > { %3264 = vmatmul.mubr.msk.bf16.gmra.mrb[64].mxu0 %vm795_vm2, %v4219_v28 }
  0xe5   : > { %3267 = vmatprep.mubr.msk.bf16.mxu0 %vm795_vm2, %v4222_v26 }
  0xe6   : > { %3238 = vmatmul.mubr.msk.bf16.gmra.mrb[64].mxu1 %vm795_vm2, %v3904_v51  ;;  %v4986_v51 = vld [vmem:[#allocation20_spill] sm:$0xff] }
  0xe7   : > { %3241 = vmatprep.mubr.msk.bf16.mxu1 %vm795_vm2, %v3779_v63  ;;  %v4985_v63 = vld [vmem:[#allocation19_spill] sm:$0xff] }
  0xec   : > { %3268 = vmatmul.mubr.msk.bf16.gmra.mrb[68].mxu0 %vm795_vm2, %v4225_v0 }
  0xed   : > { %3271 = vmatprep.mubr.msk.bf16.mxu0 %vm795_vm2, %v4982_v55 }
  0xee   : > { %3242 = vmatmul.mubr.msk.bf16.gmra.mrb[68].mxu1 %vm795_vm2, %v3785_v2  ;;  %v4987_v2 = vld [vmem:[#allocation21_spill] sm:$0xff] }
  0xef   : > { %3245 = vmatprep.mubr.msk.bf16.mxu1 %vm795_vm2, %v3831_v27 }
  0xf4   : > { %3272 = vmatmul.mubr.msk.bf16.gmra.mrb[72].mxu0 %vm795_vm2, %v4983_v34 }
  0xf5   : > { %3275 = vmatprep.mubr.msk.bf16.mxu0 %vm795_vm2, %v4984_v47 }
  0xf6   : > { %3246 = vmatmul.mubr.msk.bf16.gmra.mrb[72].mxu1 %vm795_vm2, %v3855_v40 }
  0xf7   : > { %3249 = vmatprep.mubr.msk.bf16.mxu1 %vm795_vm2, %v3900_v50 }
  0xfc   : > { %3276 = vmatmul.mubr.msk.bf16.gmra.mrb[76].mxu0 %vm795_vm2, %v4985_v63 }
  0xfd   : > { %3279 = vmatprep.mubr.msk.bf16.mxu0 %vm795_vm2, %v4986_v51 }
  0xfe   : > { %3250 = vmatmul.mubr.msk.bf16.gmra.mrb[76].mxu1 %vm795_vm2, %v3913_v11 }
  0xff   : > { %3253 = vmatprep.mubr.msk.bf16.mxu1 %vm795_vm2, %v4245_v52 }
 0x104   : > { %3280 = vmatmul.mubr.msk.bf16.gmra.mrb[80].mxu0 %vm795_vm2, %v4312_v44 }
 0x105   : > { %3311 = vmatprep.mubr.msk.bf16.mxu0 %vm795_vm2, %v4219_v28 }
 0x106   : > { %3254 = vmatmul.mubr.msk.bf16.gmra.mrb[80].mxu1 %vm795_vm2, %v4251_v16 }
 0x107   : > { %3285 = vmatprep.mubr.msk.bf16.mxu1 %vm795_vm2, %v4987_v2 }
 0x10c   : > { %3312 = vmatmul.mubr.msk.bf16.vlgmr.msra.gmra.mrb[84].mxu0 %vm795_vm2, %v4222_v26 }
 0x10d   : > { %3315 = vmatprep.mubr.msk.bf16.mxu0 %vm795_vm2, %v4225_v0 }
 0x10e   : > { %3286 = vmatmul.mubr.msk.bf16.vlgmr.msra.gmra.mrb[84].mxu1 %vm795_vm2, %v4298_v5 }
 0x10f   : > { %3289 = vmatprep.mubr.msk.bf16.mxu1 %vm795_vm2, %v4301_v48 }
 0x114   : > { %3316 = vmatmul.mubr.msk.bf16.gmra.mrb[88].mxu0 %vm795_vm2, %v4982_v55 }
 0x115   : > { %3319 = vmatprep.mubr.msk.bf16.mxu0 %vm795_vm2, %v4983_v34 }
 0x116   : > { %3290 = vmatmul.mubr.msk.bf16.gmra.mrb[88].mxu1 %vm795_vm2, %v4315_v4 }
 0x117   : > { %3293 = vmatprep.mubr.msk.bf16.mxu1 %vm795_vm2, %v4320_v56 }
 0x11c   : > { %3320 = vmatmul.mubr.msk.bf16.gmra.mrb[92].mxu0 %vm795_vm2, %v4984_v47 }
 0x11d   : > { %3323 = vmatprep.mubr.msk.bf16.mxu0 %vm795_vm2, %v4985_v63 }
 0x11e   : > { %3294 = vmatmul.mubr.msk.bf16.gmra.mrb[92].mxu1 %vm795_vm2, %v4323_v14 }
 0x11f   : > { %3297 = vmatprep.mubr.msk.bf16.mxu1 %vm795_vm2, %v4339_v19 }
 0x124   : > { %3324 = vmatmul.mubr.msk.bf16.gmra.mrb[96].mxu0 %vm795_vm2, %v4986_v51 }
 0x125   : > { %3327 = vmatprep.mubr.msk.bf16.mxu0 %vm795_vm2, %v4374_v23 }
 0x126   : > { %3298 = vmatmul.mubr.msk.bf16.gmra.mrb[96].mxu1 %vm795_vm2, %v4346_v17 }
 0x127   : > { %3301 = vmatprep.mubr.msk.bf16.mxu1 %vm795_vm2, %v4369_v15 }
 0x12c   : > { %3328 = vmatmul.mubr.msk.bf16.gmra.mrb[100].mxu0 %vm795_vm2, %v4397_v42 }
 0x12d   : > { %3331 = vmatprep.mubr.msk.bf16.mxu0 %vm795_vm2, %v4420_v60 }
 0x12e   : > { %3302 = vmatmul.mubr.msk.bf16.gmra.mrb[100].mxu1 %vm795_vm2, %v4380_v43 }
 0x12f   : > { %3305 = vmatprep.mubr.msk.bf16.mxu1 %vm795_vm2, %v4414_v13 }
 0x134   : > { %3332 = vmatmul.mubr.msk.bf16.gmra.mrb[104].mxu0 %vm795_vm2, %v4432_v59 }
 0x136   : > { %3306 = vmatmul.mubr.msk.bf16.gmra.mrb[104].mxu1 %vm795_vm2, %v4427_v10  ;;  %v3105_v27 = vpop.f32.mrb[0].mxu0 }
 0x137   : > { %v870_v40 = vpop.f32.mrb[1].mxu0 }
 0x138   : > { %v3106_v50 = vpop.f32.mrb[2].mxu0 }
 0x139   : > { %v3117_v11 = vpop.f32.mrb[0].mxu1  ;;  %v873_v30 = vpop.f32.mrb[3].mxu0 }
 0x13a   : > { %v4565_v28 = vpop.f32.mrb[1].mxu1 }
 0x13b   : > { %v4567_v26 = vpop.f32.mrb[2].mxu1 }
 0x13c   : > { %v4569_v0 = vpop.f32.mrb[3].mxu1 }
 0x13e   : > { %v3109_v52 = vpop.f32.mrb[4].mxu0 }
 0x13f   : > { %v885_v16 = vpop.f32.mrb[5].mxu0 }
 0x140   : > { %v3110_v5 = vpop.f32.mrb[6].mxu0 }
 0x141   : > { %v4571_v48 = vpop.f32.mrb[4].mxu1  ;;  %v888_v44 = vpop.f32.mrb[7].mxu0 }
 0x142   : > { %v4573_v4 = vpop.f32.mrb[5].mxu1 }
 0x143   : > { %v4575_v56 = vpop.f32.mrb[6].mxu1 }
 0x144   : > { %v932_v14 = vpop.f32.mrb[7].mxu1 }
 0x146   : > { %v3113_v19 = vpop.f32.mrb[8].mxu0 }
 0x147   : > { %v900_v17 = vpop.f32.mrb[9].mxu0 }
 0x148   : > { %v3114_v15 = vpop.f32.mrb[10].mxu0 }
 0x149   : > { %v4577_v23 = vpop.f32.mrb[8].mxu1  ;;  %v902_v43 = vpop.f32.mrb[11].mxu0 }
 0x14a   : > { %v944_v1 = vpop.f32.mrb[9].mxu1 }
 0x14b   : > { %v3126_v8 = vpop.f32.mrb[10].mxu1 }
 0x14c   : > { %v4579_v22 = vpop.f32.mrb[11].mxu1 }
 0x14f   : > { %v3157_v33 = vpop.f32.mrb[12].mxu0 }
 0x150   : > { %v1349_v42 = vpop.f32.mrb[13].mxu0 }
 0x151   : > { %v3131_v12 = vpop.f32.mrb[12].mxu1  ;;  %v3158_v58 = vpop.f32.mrb[14].mxu0 }
 0x152   : > { %v1165_v24 = vpop.f32.mrb[13].mxu1  ;;  %v1352_v37 = vpop.f32.mrb[15].mxu0 }
 0x153   : > { %v1166_v21 = vadd.f32 %v1165_v24, %v870_v40  ;;  %v3132_v45 = vpop.f32.mrb[14].mxu1 }
 0x154   : > { %v1176_v35 = vadd.f32 %v3132_v45, %v3106_v50  ;;  %v1168_v53 = vpop.f32.mrb[15].mxu1 }
 0x155   : > { %v4581_v13 = vadd.f32 %v1349_v42, %v1166_v21  ;;  %v1169_v49 = vadd.f32 %v1168_v53, %v873_v30 }
 0x156   : > { %v4583_v31 = vadd.f32 %v3158_v58, %v1176_v35 }
 0x157   : > { %v4585_v20 = vadd.f32 %v1352_v37, %v1169_v49  ;;  %v3161_v7 = vpop.f32.mrb[16].mxu0 }
 0x158   : > { %v1364_v38 = vpop.f32.mrb[17].mxu0 }
 0x159   : > { %v3135_v54 = vpop.f32.mrb[16].mxu1  ;;  %v3162_v41 = vpop.f32.mrb[18].mxu0 }
 0x15a   : > { %v1188_v60 = vadd.f32 %v3135_v54, %v3109_v52  ;;  %v1180_v3 = vpop.f32.mrb[17].mxu1  ;;  %v1367_v9 = vpop.f32.mrb[19].mxu0 }
 0x15b   : > { %v1181_v61 = vadd.f32 %v1180_v3, %v885_v16  ;;  %v3136_v10 = vpop.f32.mrb[18].mxu1 }
 0x15c   : > { %v4587_v59 = vadd.f32 %v3161_v7, %v1188_v60  ;;  %v1191_v32 = vadd.f32 %v3136_v10, %v3110_v5  ;;  %v1183_v29 = vpop.f32.mrb[19].mxu1 }
 0x15d   : > { %v4589_v36 = vadd.f32 %v1364_v38, %v1181_v61 }
 0x15e   : > { %v4591_v39 = vadd.f32 %v3162_v41, %v1191_v32 }
 0x15f   : > { %v3165_v6 = vpop.f32.mrb[20].mxu0 }
 0x160   : > { %v1379_v18 = vpop.f32.mrb[21].mxu0 }
 0x161   : > { %v3139_v25 = vpop.f32.mrb[20].mxu1  ;;  %v3166_v46 = vpop.f32.mrb[22].mxu0 }
 0x162   : > { %v1203_v62 = vadd.f32 %v3139_v25, %v3113_v19  ;;  %v1195_v57 = vpop.f32.mrb[21].mxu1  ;;  %v1381_v55 = vpop.f32.mrb[23].mxu0 }
 0x163   : > { %v3140_v34 = vpop.f32.mrb[22].mxu1 }
 0x164   : > { %v4593_v47 = vadd.f32 %v3165_v6, %v1203_v62  ;;  %v1197_v63 = vpop.f32.mrb[23].mxu1 }
 0x165   : > { %v1198_v51 = vadd.f32 %v1197_v63, %v902_v43 }
 0x167   : > { %v4595_v2 = vadd.f32 %v1381_v55, %v1198_v51  ;;  %v3169_v27 = vpop.f32.mrb[24].mxu0 }
 0x168   : > { %v1393_v40 = vpop.f32.mrb[25].mxu0 }
 0x169   : > { %v3143_v50 = vpop.f32.mrb[24].mxu1  ;;  %v3170_v11 = vpop.f32.mrb[26].mxu0 }
 0x16a   : > { %v1209_v30 = vpop.f32.mrb[25].mxu1  ;;  %v1396_v52 = vpop.f32.mrb[27].mxu0 }
 0x16b   : > { %v1210_v16 = vadd.f32 %v1209_v30, %v4565_v28  ;;  %v3144_v5 = vpop.f32.mrb[26].mxu1 }
 0x16c   : > { %v1220_v44 = vadd.f32 %v3144_v5, %v4567_v26  ;;  %v1212_v14 = vpop.f32.mrb[27].mxu1 }
 0x16d   : > { %v4599_v19 = vadd.f32 %v1393_v40, %v1210_v16  ;;  %v1213_v17 = vadd.f32 %v1212_v14, %v4569_v0 }
 0x16e   : > { %v4602_v15 = vadd.f32 %v3170_v11, %v1220_v44 }
 0x16f   : > { %v4604_v43 = vadd.f32 %v1396_v52, %v1213_v17  ;;  %v3173_v1 = vpop.f32.mrb[28].mxu0 }
 0x170   : > { %v1408_v8 = vpop.f32.mrb[29].mxu0 }
 0x171   : > { %v3147_v33 = vpop.f32.mrb[28].mxu1  ;;  %v3174_v42 = vpop.f32.mrb[30].mxu0 }
 0x172   : > { %v1232_v12 = vadd.f32 %v3147_v33, %v4571_v48  ;;  %v1224_v58 = vpop.f32.mrb[29].mxu1  ;;  %v1411_v28 = vpop.f32.mrb[31].mxu0 }
 0x173   : > { %v1225_v24 = vadd.f32 %v1224_v58, %v4573_v4  ;;  %v3148_v26 = vpop.f32.mrb[30].mxu1 }
 0x174   : > { %v4608_v37 = vadd.f32 %v3173_v1, %v1232_v12  ;;  %v1235_v21 = vadd.f32 %v3148_v26, %v4575_v56  ;;  %v1227_v0 = vpop.f32.mrb[31].mxu1 }
 0x175   : > { %v4611_v45 = vadd.f32 %v1408_v8, %v1225_v24 }
 0x176   : > { %v4613_v35 = vadd.f32 %v3174_v42, %v1235_v21 }
 0x177   : > { %v3177_v53 = vpop.f32.mrb[32].mxu0 }
 0x178   : > { %v1423_v49 = vpop.f32.mrb[33].mxu0 }
 0x179   : > { %v3151_v7 = vpop.f32.mrb[32].mxu1  ;;  %v3178_v38 = vpop.f32.mrb[34].mxu0 }
 0x17a   : > { %v1247_v48 = vadd.f32 %v3151_v7, %v4577_v23  ;;  %v1239_v54 = vpop.f32.mrb[33].mxu1  ;;  %v1425_v41 = vpop.f32.mrb[35].mxu0 }
 0x17b   : > { %v3152_v60 = vpop.f32.mrb[34].mxu1 }
 0x17c   : > { %v4616_v4 = vadd.f32 %v3177_v53, %v1247_v48  ;;  %v1241_v3 = vpop.f32.mrb[35].mxu1 }
 0x17d   : > { %v1242_v9 = vadd.f32 %v1241_v3, %v4579_v22 }
 0x17f   : > { %v4619_v56 = vadd.f32 %v1425_v41, %v1242_v9  ;;  %v3209_v61 = vpop.f32.mrb[36].mxu0 }
 0x180   : > { %v1683_v10 = vpop.f32.mrb[37].mxu0 }
 0x181   : > { %v3183_v32 = vpop.f32.mrb[36].mxu1  ;;  %v3210_v29 = vpop.f32.mrb[38].mxu0 }
 0x182   : > { %v1517_v6 = vpop.f32.mrb[37].mxu1  ;;  %v1686_v18 = vpop.f32.mrb[39].mxu0 }
 0x183   : > { %v1604_v25 = vadd.f32 %v1517_v6, %v4581_v13  ;;  %v3184_v46 = vpop.f32.mrb[38].mxu1 }
 0x184   : > { %v1606_v23 = vadd.f32 %v3184_v46, %v4583_v31  ;;  %v1520_v62 = vpop.f32.mrb[39].mxu1 }
 0x185   : > { %v4623_v57 = vadd.f32 %v1683_v10, %v1604_v25  ;;  %v1605_v55 = vadd.f32 %v1520_v62, %v4585_v20 }
 0x186   : > { %v4626_v34 = vadd.f32 %v3210_v29, %v1606_v23 }
 0x187   : > { %v4628_v22 = vadd.f32 %v1686_v18, %v1605_v55  ;;  %v3213_v63 = vpop.f32.mrb[40].mxu0 }
 0x188   : > { %v1698_v51 = vpop.f32.mrb[41].mxu0 }
 0x189   : > { %v3187_v27 = vpop.f32.mrb[40].mxu1  ;;  %v3214_v40 = vpop.f32.mrb[42].mxu0 }
 0x18a   : > { %v1608_v50 = vadd.f32 %v3187_v27, %v4587_v59  ;;  %v1532_v11 = vpop.f32.mrb[41].mxu1  ;;  %v1701_v13 = vpop.f32.mrb[43].mxu0 }
 0x18b   : > { %v1607_v30 = vadd.f32 %v1532_v11, %v4589_v36  ;;  %v3188_v31 = vpop.f32.mrb[42].mxu1 }
 0x18c   : > { %v4632_v52 = vadd.f32 %v3213_v63, %v1608_v50  ;;  %v1609_v16 = vadd.f32 %v3188_v31, %v4591_v39  ;;  %v1535_v20 = vpop.f32.mrb[43].mxu1 }
 0x18d   : > { %v4635_v5 = vadd.f32 %v1698_v51, %v1607_v30 }
 0x18e   : > { %v4637_v44 = vadd.f32 %v3214_v40, %v1609_v16 }
 0x18f   : > { %v3217_v14 = vpop.f32.mrb[44].mxu0 }
 0x190   : > { %v1713_v17 = vpop.f32.mrb[45].mxu0 }
 0x191   : > { %v3191_v1 = vpop.f32.mrb[44].mxu1  ;;  %v3218_v8 = vpop.f32.mrb[46].mxu0 }
 0x192   : > { %v1611_v59 = vadd.f32 %v3191_v1, %v4593_v47  ;;  %v1547_v33 = vpop.f32.mrb[45].mxu1  ;;  %v1715_v42 = vpop.f32.mrb[47].mxu0 }
 0x193   : > { %v3192_v12 = vpop.f32.mrb[46].mxu1 }
 0x194   : > { %v4640_v36 = vadd.f32 %v3217_v14, %v1611_v59  ;;  %v1549_v58 = vpop.f32.mrb[47].mxu1 }
 0x195   : > { %v1610_v28 = vadd.f32 %v1549_v58, %v4595_v2 }
 0x197   : > { %v4643_v39 = vadd.f32 %v1715_v42, %v1610_v28  ;;  %v3221_v24 = vpop.f32.mrb[48].mxu0 }
 0x198   : > { %v1727_v26 = vpop.f32.mrb[49].mxu0 }
 0x199   : > { %v3195_v21 = vpop.f32.mrb[48].mxu1  ;;  %v3222_v0 = vpop.f32.mrb[50].mxu0 }
 0x19a   : > { %v1561_v53 = vpop.f32.mrb[49].mxu1  ;;  %v1730_v49 = vpop.f32.mrb[51].mxu0 }
 0x19b   : > { %v1612_v7 = vadd.f32 %v1561_v53, %v4599_v19  ;;  %v3196_v38 = vpop.f32.mrb[50].mxu1 }
 0x19c   : > { %v1614_v47 = vadd.f32 %v3196_v38, %v4602_v15  ;;  %v1564_v48 = vpop.f32.mrb[51].mxu1 }
 0x19d   : > { %v4647_v54 = vadd.f32 %v1727_v26, %v1612_v7  ;;  %v1613_v41 = vadd.f32 %v1564_v48, %v4604_v43 }
 0x19e   : > { %v4650_v60 = vadd.f32 %v3222_v0, %v1614_v47 }
 0x19f   : > { %v4652_v2 = vadd.f32 %v1730_v49, %v1613_v41  ;;  %v3225_v3 = vpop.f32.mrb[52].mxu0 }
 0x1a0   : > { %v1742_v9 = vpop.f32.mrb[53].mxu0 }
 0x1a1   : > { %v3199_v61 = vpop.f32.mrb[52].mxu1  ;;  %v3226_v10 = vpop.f32.mrb[54].mxu0 }
 0x1a2   : > { %v1616_v32 = vadd.f32 %v3199_v61, %v4608_v37  ;;  %v1576_v29 = vpop.f32.mrb[53].mxu1  ;;  %v1745_v19 = vpop.f32.mrb[55].mxu0 }
 0x1a3   : > { %v1615_v6 = vadd.f32 %v1576_v29, %v4611_v45  ;;  %v3200_v15 = vpop.f32.mrb[54].mxu1 }
 0x1a4   : > { %v4656_v18 = vadd.f32 %v3225_v3, %v1616_v32  ;;  %v1617_v25 = vadd.f32 %v3200_v15, %v4613_v35  ;;  %v1579_v43 = vpop.f32.mrb[55].mxu1 }
 0x1a5   : > { %v4659_v46 = vadd.f32 %v1742_v9, %v1615_v6 }
 0x1a6   : > { %v4661_v23 = vadd.f32 %v3226_v10, %v1617_v25 }
 0x1a7   : > { %v3229_v62 = vpop.f32.mrb[56].mxu0 }
 0x1a8   : > { %v1757_v55 = vpop.f32.mrb[57].mxu0 }
 0x1a9   : > { %v3203_v63 = vpop.f32.mrb[56].mxu1  ;;  %v3230_v51 = vpop.f32.mrb[58].mxu0 }
 0x1aa   : > { %v1619_v37 = vadd.f32 %v3203_v63, %v4616_v4  ;;  %v1591_v27 = vpop.f32.mrb[57].mxu1  ;;  %v1759_v40 = vpop.f32.mrb[59].mxu0 }
 0x1ab   : > { %v3204_v50 = vpop.f32.mrb[58].mxu1 }
 0x1ac   : > { %v4664_v45 = vadd.f32 %v3229_v62, %v1619_v37  ;;  %v1593_v11 = vpop.f32.mrb[59].mxu1 }
 0x1ad   : > { %v1618_v13 = vadd.f32 %v1593_v11, %v4619_v56 }
 0x1af   : > { %v4667_v35 = vadd.f32 %v1759_v40, %v1618_v13  ;;  %v3261_v30 = vpop.f32.mrb[60].mxu0 }
 0x1b0   : > { %v2059_v31 = vpop.f32.mrb[61].mxu0 }
 0x1b1   : > { %v3235_v16 = vpop.f32.mrb[60].mxu1  ;;  %v3262_v20 = vpop.f32.mrb[62].mxu0 }
 0x1b2   : > { %v1835_v14 = vpop.f32.mrb[61].mxu1  ;;  %v2062_v17 = vpop.f32.mrb[63].mxu0 }
 0x1b3   : > { %v1922_v1 = vadd.f32 %v1835_v14, %v4623_v57  ;;  %v3236_v8 = vpop.f32.mrb[62].mxu1 }
 0x1b4   : > { %v1924_v4 = vadd.f32 %v3236_v8, %v4626_v34  ;;  %v1838_v59 = vpop.f32.mrb[63].mxu1 }
 0x1b5   : > { %v4671_v33 = vadd.f32 %v2059_v31, %v1922_v1  ;;  %v1923_v42 = vadd.f32 %v1838_v59, %v4628_v22 }
 0x1b6   : > { %v4674_v12 = vadd.f32 %v3262_v20, %v1924_v4 }
 0x1b7   : > { %v4676_v56 = vadd.f32 %v2062_v17, %v1923_v42  ;;  %v3265_v58 = vpop.f32.mrb[64].mxu0 }
 0x1b8   : > { %v2074_v28 = vpop.f32.mrb[65].mxu0 }
 0x1b9   : > { %v3239_v24 = vpop.f32.mrb[64].mxu1  ;;  %v3266_v26 = vpop.f32.mrb[66].mxu0 }
 0x1ba   : > { %v1926_v21 = vadd.f32 %v3239_v24, %v4632_v52  ;;  %v1850_v0 = vpop.f32.mrb[65].mxu1  ;;  %v2077_v57 = vpop.f32.mrb[67].mxu0 }
 0x1bb   : > { %v1925_v53 = vadd.f32 %v1850_v0, %v4635_v5  ;;  %v3240_v34 = vpop.f32.mrb[66].mxu1 }
 0x1bc   : > { %v4680_v49 = vadd.f32 %v3265_v58, %v1926_v21  ;;  %v1927_v7 = vadd.f32 %v3240_v34, %v4637_v44  ;;  %v1853_v22 = vpop.f32.mrb[67].mxu1 }
 0x1bd   : > { %v4683_v38 = vadd.f32 %v2074_v28, %v1925_v53 }
 0x1be   : > { %v4685_v47 = vadd.f32 %v3266_v26, %v1927_v7 }
 0x1bf   : > { %v3269_v48 = vpop.f32.mrb[68].mxu0 }
 0x1c0   : > { %v2089_v41 = vpop.f32.mrb[69].mxu0 }
 0x1c1   : > { %v3243_v3 = vpop.f32.mrb[68].mxu1  ;;  %v3270_v9 = vpop.f32.mrb[70].mxu0 }
 0x1c2   : > { %v1929_v52 = vadd.f32 %v3243_v3, %v4640_v36  ;;  %v1865_v61 = vpop.f32.mrb[69].mxu1  ;;  %v2091_v10 = vpop.f32.mrb[71].mxu0  ;;  %v4721_v9 = vld [vmem:[%s4854_s4] ss:$0 sm:$0xff] }
 0x1c3   : > { %v3244_v32 = vpop.f32.mrb[70].mxu1 }
 0x1c4   : > { %v4688_v5 = vadd.f32 %v3269_v48, %v1929_v52  ;;  %v1867_v29 = vpop.f32.mrb[71].mxu1 }
 0x1c5   : > { %v1928_v19 = vadd.f32 %v1867_v29, %v4643_v39 }
 0x1c7   : > { %v4691_v44 = vadd.f32 %v2091_v10, %v1928_v19  ;;  %v3273_v6 = vpop.f32.mrb[72].mxu0 }
 0x1c8   : > { %v2103_v15 = vpop.f32.mrb[73].mxu0 }
 0x1c9   : > { %v3247_v25 = vpop.f32.mrb[72].mxu1  ;;  %v3274_v43 = vpop.f32.mrb[74].mxu0 }
 0x1ca   : > { %v1879_v62 = vpop.f32.mrb[73].mxu1  ;;  %v2106_v55 = vpop.f32.mrb[75].mxu0 }
 0x1cb   : > { %v1930_v63 = vadd.f32 %v1879_v62, %v4647_v54  ;;  %v3248_v51 = vpop.f32.mrb[74].mxu1 }
 0x1cc   : > { %v1932_v36 = vadd.f32 %v3248_v51, %v4650_v60  ;;  %v1882_v37 = vpop.f32.mrb[75].mxu1 }
 0x1cd   : > { %v4695_v27 = vadd.f32 %v2103_v15, %v1930_v63  ;;  %v1931_v40 = vadd.f32 %v1882_v37, %v4652_v2 }
 0x1ce   : > { %v4698_v50 = vadd.f32 %v3274_v43, %v1932_v36 }
 0x1cf   : > { %v4700_v39 = vadd.f32 %v2106_v55, %v1931_v40  ;;  %v3277_v11 = vpop.f32.mrb[76].mxu0 }
 0x1d0   : > { %v2118_v13 = vpop.f32.mrb[77].mxu0 }
 0x1d1   : > { %v3251_v30 = vpop.f32.mrb[76].mxu1  ;;  %v3278_v31 = vpop.f32.mrb[78].mxu0 }
 0x1d2   : > { %v1934_v16 = vadd.f32 %v3251_v30, %v4656_v18  ;;  %v1894_v20 = vpop.f32.mrb[77].mxu1  ;;  %v2121_v54 = vpop.f32.mrb[79].mxu0 }
 0x1d3   : > { %v1933_v14 = vadd.f32 %v1894_v20, %v4659_v46  ;;  %v3252_v60 = vpop.f32.mrb[78].mxu1 }
 0x1d4   : > { %v4704_v17 = vadd.f32 %v3277_v11, %v1934_v16  ;;  %v1935_v1 = vadd.f32 %v3252_v60, %v4661_v23  ;;  %v1897_v2 = vpop.f32.mrb[79].mxu1 }
 0x1d5   : > { %v4707_v8 = vadd.f32 %v2118_v13, %v1933_v14 }
 0x1d6   : > { %v4709_v4 = vadd.f32 %v3278_v31, %v1935_v1 }
 0x1d7   : > { %v3281_v59 = vpop.f32.mrb[80].mxu0 }
 0x1d8   : > { %v2133_v42 = vpop.f32.mrb[81].mxu0 }
 0x1d9   : > { %v3255_v58 = vpop.f32.mrb[80].mxu1  ;;  %v3282_v28 = vpop.f32.mrb[82].mxu0 }
 0x1da   : > { %v1937_v18 = vadd.f32 %v3255_v58, %v4664_v45  ;;  %v1909_v24 = vpop.f32.mrb[81].mxu1  ;;  %v2135_v26 = vpop.f32.mrb[83].mxu0 }
 0x1db   : > { %v3256_v21 = vpop.f32.mrb[82].mxu1 }
 0x1dc   : > { %v4712_v46 = vadd.f32 %v3281_v59, %v1937_v18  ;;  %v1911_v0 = vpop.f32.mrb[83].mxu1 }
 0x1dd   : > { %v1936_v57 = vadd.f32 %v1911_v0, %v4667_v35 }
 0x1df   : > { %v4715_v23 = vadd.f32 %v2135_v26, %v1936_v57  ;;  %v3313_v53 = vpop.f32.mrb[84].mxu0 }
 0x1e0   : > { %v2457_v34 = vpop.f32.mrb[85].mxu0 }
 0x1e1   : > { %v3287_v7 = vpop.f32.mrb[84].mxu1  ;;  %v3314_v22 = vpop.f32.mrb[86].mxu0 }
 0x1e2   : > { %v2278_v48 = vpop.f32.mrb[85].mxu1  ;;  %v2460_v41 = vpop.f32.mrb[87].mxu0 }
 0x1e3   : > { %v2365_v3 = vadd.f32 %v2278_v48, %v4671_v33  ;;  %v3288_v45 = vpop.f32.mrb[86].mxu1 }
 0x1e4   : > { %v2367_v35 = vadd.f32 %v3288_v45, %v4674_v12  ;;  %v2281_v52 = vpop.f32.mrb[87].mxu1 }
 0x1e5   : > { %v2544_v61 = vadd.f32 %v2457_v34, %v2365_v3  ;;  %v2366_v10 = vadd.f32 %v2281_v52, %v4676_v56 }
 0x1e6   : > { %v2546_v32 = vadd.f32 %v3314_v22, %v2367_v35 }
 0x1e7   : > { %v2567_v29 = vadd.f32 %v4721_v9, %v2544_v61  ;;  %v2545_v19 = vadd.f32 %v2460_v41, %v2366_v10  ;;  %v3317_v33 = vpop.f32.mrb[88].mxu0 }
 0x1e8   : > { %v2569_v6 = vadd.f32 %v4721_v9, %v2546_v32  ;;  %v2472_v15 = vpop.f32.mrb[89].mxu0 }
 0x1e9   : > { %2584 = vst.msk [vmem:[%s3696_s23] sm:$0xff] %vm2583_vm5, %v2567_v29  ;;  %v2568_v25 = vadd.f32 %v4721_v9, %v2545_v19  ;;  %v3291_v43 = vpop.f32.mrb[88].mxu1  ;;  %v3318_v12 = vpop.f32.mrb[90].mxu0 }
 0x1ea   : > { %2586 = vst.msk [vmem:[%s3696_s23 + $0x10] sm:$0xff] %vm2583_vm5, %v2569_v6  ;;  %v2369_v56 = vadd.f32 %v3291_v43, %v4680_v49  ;;  %v2293_v62 = vpop.f32.mrb[89].mxu1  ;;  %v2475_v55 = vpop.f32.mrb[91].mxu0 }
 0x1eb   : > { %2585 = vst.msk [vmem:[%s3696_s23 + $0x8] sm:$0xff] %vm2583_vm5, %v2568_v25  ;;  %v2368_v63 = vadd.f32 %v2293_v62, %v4683_v38  ;;  %v3292_v51 = vpop.f32.mrb[90].mxu1 }
 0x1ec   : > { %v2548_v36 = vadd.f32 %v3317_v33, %v2369_v56  ;;  %v2370_v37 = vadd.f32 %v3292_v51, %v4685_v47  ;;  %v2296_v40 = vpop.f32.mrb[91].mxu1 }
 0x1ed   : > { %v2547_v11 = vadd.f32 %v2472_v15, %v2368_v63 }
 0x1ee   : > { %v2571_v13 = vadd.f32 %v4721_v9, %v2548_v36  ;;  %v2549_v30 = vadd.f32 %v3318_v12, %v2370_v37 }
 0x1ef   : > { %v2570_v31 = vadd.f32 %v4721_v9, %v2547_v11  ;;  %v3321_v49 = vpop.f32.mrb[92].mxu0 }
 0x1f0   : > { %2588 = vst.msk [vmem:[%s3696_s23 + $0x20] sm:$0xff] %vm2583_vm5, %v2571_v13  ;;  %v2572_v16 = vadd.f32 %v4721_v9, %v2549_v30  ;;  %v2487_v20 = vpop.f32.mrb[93].mxu0 }
 0x1f1   : > { %2587 = vst.msk [vmem:[%s3696_s23 + $0x18] sm:$0xff] %vm2583_vm5, %v2570_v31  ;;  %v3295_v38 = vpop.f32.mrb[92].mxu1  ;;  %v3322_v54 = vpop.f32.mrb[94].mxu0 }
 0x1f2   : > { %2589 = vst.msk [vmem:[%s3696_s23 + $0x28] sm:$0xff] %vm2583_vm5, %v2572_v16  ;;  %v2372_v47 = vadd.f32 %v3295_v38, %v4688_v5  ;;  %v2308_v14 = vpop.f32.mrb[93].mxu1  ;;  %v2489_v60 = vpop.f32.mrb[95].mxu0 }
 0x1f3   : > { %v3296_v1 = vpop.f32.mrb[94].mxu1 }
 0x1f4   : > { %v2551_v2 = vadd.f32 %v3321_v49, %v2372_v47  ;;  %v2310_v59 = vpop.f32.mrb[95].mxu1 }
 0x1f5   : > { %v2371_v42 = vadd.f32 %v2310_v59, %v4691_v44 }
 0x1f6   : > { %v2574_v58 = vadd.f32 %v4721_v9, %v2551_v2 }
 0x1f7   : > { %v2550_v28 = vadd.f32 %v2489_v60, %v2371_v42  ;;  %v3325_v18 = vpop.f32.mrb[96].mxu0 }
 0x1f8   : > { %2591 = vst.msk [vmem:[%s3696_s23 + $0x38] sm:$0xff] %vm2583_vm5, %v2574_v58  ;;  %v2501_v24 = vpop.f32.mrb[97].mxu0 }
 0x1f9   : > { %v2573_v26 = vadd.f32 %v4721_v9, %v2550_v28  ;;  %v3299_v21 = vpop.f32.mrb[96].mxu1  ;;  %v3326_v0 = vpop.f32.mrb[98].mxu0 }
 0x1fa   : > { %v2322_v5 = vpop.f32.mrb[97].mxu1  ;;  %v2504_v57 = vpop.f32.mrb[99].mxu0 }
 0x1fb   : > { %2590 = vst.msk [vmem:[%s3696_s23 + $0x30] sm:$0xff] %vm2583_vm5, %v2573_v26  ;;  %v2373_v53 = vadd.f32 %v2322_v5, %v4695_v27  ;;  %v3300_v44 = vpop.f32.mrb[98].mxu1 }
 0x1fc   : > { %v2375_v34 = vadd.f32 %v3300_v44, %v4698_v50  ;;  %v2325_v7 = vpop.f32.mrb[99].mxu1 }
 0x1fd   : > { %v2552_v22 = vadd.f32 %v2501_v24, %v2373_v53  ;;  %v2374_v48 = vadd.f32 %v2325_v7, %v4700_v39 }
 0x1fe   : > { %v2554_v41 = vadd.f32 %v3326_v0, %v2375_v34 }
 0x1ff   : > { %v2575_v3 = vadd.f32 %v4721_v9, %v2552_v22  ;;  %v2553_v45 = vadd.f32 %v2504_v57, %v2374_v48  ;;  %v3329_v35 = vpop.f32.mrb[100].mxu0 }
 0x200   : > { %v2577_v52 = vadd.f32 %v4721_v9, %v2554_v41  ;;  %v2516_v61 = vpop.f32.mrb[101].mxu0 }
 0x201   : > { %2592 = vst.msk [vmem:[%s3696_s23 + $0x40] sm:$0xff] %vm2583_vm5, %v2575_v3  ;;  %v2576_v27 = vadd.f32 %v4721_v9, %v2553_v45  ;;  %v3303_v10 = vpop.f32.mrb[100].mxu1  ;;  %v3330_v32 = vpop.f32.mrb[102].mxu0 }
 0x202   : > { %2594 = vst.msk [vmem:[%s3696_s23 + $0x50] sm:$0xff] %vm2583_vm5, %v2577_v52  ;;  %v2377_v50 = vadd.f32 %v3303_v10, %v4704_v17  ;;  %v2337_v39 = vpop.f32.mrb[101].mxu1  ;;  %v2519_v29 = vpop.f32.mrb[103].mxu0 }
 0x203   : > { %2593 = vst.msk [vmem:[%s3696_s23 + $0x48] sm:$0xff] %vm2583_vm5, %v2576_v27  ;;  %v2376_v19 = vadd.f32 %v2337_v39, %v4707_v8  ;;  %v3304_v33 = vpop.f32.mrb[102].mxu1 }
 0x204   : > { %v2556_v6 = vadd.f32 %v3329_v35, %v2377_v50  ;;  %v2378_v15 = vadd.f32 %v3304_v33, %v4709_v4  ;;  %v2340_v25 = vpop.f32.mrb[103].mxu1 }
 0x205   : > { %v2555_v43 = vadd.f32 %v2516_v61, %v2376_v19 }
 0x206   : > { %v2579_v12 = vadd.f32 %v4721_v9, %v2556_v6  ;;  %v2557_v56 = vadd.f32 %v3330_v32, %v2378_v15 }
 0x207   : > { %v2578_v17 = vadd.f32 %v4721_v9, %v2555_v43  ;;  %v3333_v62 = vpop.f32.mrb[104].mxu0 }
 0x208   : > { %2596 = vst.msk [vmem:[%s3696_s23 + $0x60] sm:$0xff] %vm2583_vm5, %v2579_v12  ;;  %v2580_v8 = vadd.f32 %v4721_v9, %v2557_v56  ;;  %v2531_v55 = vpop.f32.mrb[105].mxu0 }
 0x209   : > { %2595 = vst.msk [vmem:[%s3696_s23 + $0x58] sm:$0xff] %vm2583_vm5, %v2578_v17  ;;  %v3307_v4 = vpop.f32.mrb[104].mxu1  ;;  %v3334_v63 = vpop.f32.mrb[106].mxu0 }
 0x20a   : > { %2597 = vst.msk [vmem:[%s3696_s23 + $0x68] sm:$0xff] %vm2583_vm5, %v2580_v8  ;;  %v2380_v51 = vadd.f32 %v3307_v4, %v4712_v46  ;;  %v2352_v36 = vpop.f32.mrb[105].mxu1  ;;  %v2533_v37 = vpop.f32.mrb[107].mxu0 }
 0x20b   : > { %v3308_v40 = vpop.f32.mrb[106].mxu1 }
 0x20c   : > { %v2559_v11 = vadd.f32 %v3333_v62, %v2380_v51  ;;  %v2354_v13 = vpop.f32.mrb[107].mxu1 }
 0x20d   : > { %v2379_v30 = vadd.f32 %v2354_v13, %v4715_v23 }
 0x20e   : > { %v2582_v31 = vadd.f32 %v4721_v9, %v2559_v11 }
 0x20f   : > { %v2558_v49 = vadd.f32 %v2533_v37, %v2379_v30 }
 0x210   : > { %2599 = vst.msk [vmem:[%s3696_s23 + $0x78] sm:$0xff] %vm2583_vm5, %v2582_v31 }
 0x211   : > { %v2581_v46 = vadd.f32 %v4721_v9, %v2558_v49 }
 0x213   : > { %2598 = vst.msk [vmem:[%s3696_s23 + $0x70] sm:$0xff] %vm2583_vm5, %v2581_v46 }
 0x214   : > { %3472 = shalt.err (!%p3469_p2)
}
 0x215   : > { %s3473_s23 = scalar_lea.hbm %s4789_s27, 2048  ;;  %s3477_s9 = scalar_lea.hbm %s4855_s5, 8192 }
 0x216   : > { %p3474_p4 = scmp.ne.s32.totalorder %s4789_s27, %s3473_s23  ;;  %p3478_p7 = scmp.lt.u32.totalorder %s4789_s27, %s4855_s5 }
 0x217   : > { %p3479_p9 = scmp.lt.u32.totalorder %s3477_s9, %s3473_s23  ;;  %p3481_p11 = scmp.lt.u32.totalorder %s3473_s23, %s4789_s27 }
 0x218   : > { %p3475_p5 = pnand %p3474_p4, %p3642_p3 }
 0x219   : > { %p3480_p10 = por %p3479_p9, %p3478_p7 }
 0x21a   : > { %p3476_p6 = pneg %p3475_p5 }
 0x21b   : > { %p3482_p12 = por %p3481_p11, %p3480_p10 }
 0x21d   : > { %p3483_p13 = pnand %p3482_p12, %p3476_p6 }
 0x21f   : > { %3486 = shalt.err (!%p3483_p13)
}
 0x220   : > { %s3559_s24 = smov 128   ;;  %s3560_s28 = smov 8  }
 0x221   : > { %3347 = dma.vmem_to_hbm [thread:$0]  (%p3642_p3), %s4791_s7, 2048, %s4789_s27, %s4798_s10, %s3559_s24, %s3559_s24, %s3560_s28  }
 0x222 PF: > { %p3353_p0 = scmp.ge.s32.totalorder %s3553_s25, 2  ;;  %s2632_s21 = sand.u32 1, %s3525_s18  }
 0x223   : > { %s2633_s22 = scalar_lea.sflag [#allocation4], %s2632_s21 }
 0x224   : > { %p3350_p1 = pnand %p3353_p0, %p3651_p8 }
 0x226   : > { %3520 = dma.done.wait (!%p3350_p1), %s2633_s22, 2048  }
 0x227   : > { %3522 = vsyncadd (!%p3350_p1), %s2633_s22, 4294965248  ;;  %s18_s25 = sadd.s32 1, %s3553_s25   ;;  %s4990_s11 = sld [smem:[#allocation6_spill]] }
 0x228   : > { %p15_p2 = scmp.ge.s32.totalorder %s18_s25, 6   ;;  %s4991_s20 = sld [smem:[#allocation12_spill]] }
 0x229   : > { %s4992_s21 = sld [smem:[#allocation7_spill]]  ;;  %s4993_s22 = sld [smem:[#allocation8_spill]] }
 0x22a   : > { %s4994_s23 = sld [smem:[#allocation9_spill]]  ;;  %s4995_s24 = sld [smem:[#allocation10_spill]] }
 0x22b   : > { %s4996_s18 = smov %s3529_s19  ;;  %17 = sbr.rel (!%p15_p2) target bundleno = 5 (0x5), region = 110 }
 0x22d   : > { %s4997_s19 = smov %s4990_s11 }
 0x232   :  { %2638 = vsyncpa [#allocation4], 1 }
 0x233   :  { %2640 = vsyncpa [#allocation4 + $0x1], 1 }

</bundles_post_ra>
